<compile_context>
chip_gen: v7x
topology: tpu7x:2x2x1
jax: 0.10.0
libtpu: 0.0.40
codegen_flags: <defaults>
</compile_context>

<pallas_src>
import functools

import jax
import jax.numpy as jnp
import numpy as np
from jax.experimental import pallas as pl
from jax.experimental.pallas import tpu as pltpu

# ---------------------------------------------------------------------------
# Config (small synthetic DINOv2-style ViT)
# ---------------------------------------------------------------------------
IMG = 16
PATCH = 8
C_IN = 3
EMBED = 32
DEPTH = 2
HEADS = 4
HEAD_DIM = EMBED // HEADS
MLP_HIDDEN = 4 * EMBED
NUM_PREFIX = 1          # DINOv2 cls token
LN_EPS = 1e-6
LS_INIT = 1e-5          # DINOv2 LayerScale init value
PDIM = C_IN * PATCH * PATCH

DE_MEAN = (0.5, 0.5, 0.5)
DE_STD = (0.5, 0.5, 0.5)
N_MEAN = (0.485, 0.456, 0.406)
N_STD = (0.229, 0.224, 0.225)

MATMUL_DTYPE = jnp.bfloat16   # MXU-native operand dtype; accumulation stays f32


# ---------------------------------------------------------------------------
# Fused encoder kernel: one (image, depth) grid step = one transformer block
# for one image.  Patch-embed prologue at d==0, final-LN epilogue at d==last.
# ---------------------------------------------------------------------------
def _encoder_kernel(patches_ref, add_ref, pwf_ref,
                    n1g_ref, n1b_ref, qkvw_ref, qkvb_ref, projw_ref, projb_ref,
                    ls1_ref, n2g_ref, n2b_ref, fc1w_ref, fc1b_ref, fc2w_ref,
                    fc2b_ref, ls2_ref, fng_ref, fnb_ref,
                    o_ref, h_ref,
                    *, seq, seq_pad, num_patches, heads, scale, eps):
    f32 = jnp.float32
    mmdt = MATMUL_DTYPE
    d = pl.program_id(1)

    def ln(v, g, b):
        mu = jnp.mean(v, axis=-1, keepdims=True)
        vc = v - mu
        var = jnp.mean(vc * vc, axis=-1, keepdims=True)
        return vc * jax.lax.rsqrt(var + eps) * g + b

    # --- prologue (d == 0): patch embed (rescale affine pre-folded into the
    #     weights) + cls/pos additive slab; zero-padded rows stay zero. -------
    @pl.when(d == 0)
    def _():
        tok = jnp.dot(patches_ref[0], pwf_ref[...], preferred_element_type=f32)
        h_ref[...] = tok + add_ref[...]

    h = h_ref[...]                                     # (seq_pad, EMBED) f32

    # --- transformer block d ------------------------------------------------
    y = ln(h, n1g_ref[0], n1b_ref[0]).astype(mmdt)

    # padded key rows (index >= seq) are dead -> mask out of the softmax
    kmask = jax.lax.broadcasted_iota(jnp.int32, (seq_pad, seq_pad), 1) < seq

    attn = jnp.zeros_like(h)
    for hh in range(heads):                            # heads on a leading axis
        qh = jnp.dot(y, qkvw_ref[0, hh],
                     preferred_element_type=f32) + qkvb_ref[0, hh]
        kh = jnp.dot(y, qkvw_ref[0, heads + hh],
                     preferred_element_type=f32) + qkvb_ref[0, heads + hh]
        vh = jnp.dot(y, qkvw_ref[0, 2 * heads + hh],
                     preferred_element_type=f32) + qkvb_ref[0, 2 * heads + hh]
        s = jax.lax.dot_general(qh.astype(mmdt), kh.astype(mmdt),
                                (((1,), (1,)), ((), ())),
                                preferred_element_type=f32) * scale
        s = jnp.where(kmask, s, -1e30)
        m = jnp.max(s, axis=-1, keepdims=True)
        p = jnp.exp(s - m)
        p = p * pl.reciprocal(jnp.sum(p, axis=-1, keepdims=True), approx=False)
        o = jnp.dot(p.astype(mmdt), vh.astype(mmdt), preferred_element_type=f32)
        # per-head projection summed straight into the residual contribution
        attn = attn + jnp.dot(o.astype(mmdt), projw_ref[0, hh],
                              preferred_element_type=f32)
    attn = attn + projb_ref[0]
    h = h + attn * ls1_ref[0]                          # LayerScale + residual

    y = ln(h, n2g_ref[0], n2b_ref[0]).astype(mmdt)
    y = jnp.dot(y, fc1w_ref[0], preferred_element_type=f32) + fc1b_ref[0]
    # TODO(synk): timm nn.GELU is exact (erf); tanh approximation used here
    # (the pure-JAX reference below uses the same approximation).
    y = jax.nn.gelu(y, approximate=True)
    y = jnp.dot(y.astype(mmdt), fc2w_ref[0], preferred_element_type=f32) + fc2b_ref[0]
    h = h + y * ls2_ref[0]

    h_ref[...] = h                                     # carry residual to next d

    # --- epilogue (d == last): final LN, emit patch tokens (prefix dropped) --
    @pl.when(d == pl.num_programs(1) - 1)
    def _():
        hn = ln(h, fng_ref[...], fnb_ref[...])
        o_ref[0] = hn[0:num_patches, :].astype(o_ref.dtype)


# ---------------------------------------------------------------------------
# Parameter init (deterministic, synthetic)
# ---------------------------------------------------------------------------
def init_params(key):
    keys = iter(jax.random.split(key, 64))
    nrm = lambda shape, s=0.02: (s * jax.random.normal(next(keys), shape)).astype(jnp.float32)

    num_patches = (IMG // PATCH) ** 2
    seq = num_patches + NUM_PREFIX
    params = {
        "patch_w": nrm((EMBED, C_IN, PATCH, PATCH)),   # Conv2d weight (D, C, P, P)
        "patch_b": jnp.zeros((EMBED,), jnp.float32),
        "cls_token": nrm((1, 1, EMBED)),
        "pos_embed": nrm((1, seq, EMBED)),
        "norm_g": jnp.ones((EMBED,), jnp.float32),
        "norm_b": jnp.zeros((EMBED,), jnp.float32),
        "blocks": [],
    }
    for _ in range(DEPTH):
        blk = {
            "norm1_g": jnp.ones((EMBED,), jnp.float32),
            "norm1_b": jnp.zeros((EMBED,), jnp.float32),
            "qkv_w": nrm((EMBED, 3 * EMBED)),
            "qkv_b": jnp.zeros((3 * EMBED,), jnp.float32),
            "proj_w": nrm((EMBED, EMBED)),
            "proj_b": jnp.zeros((EMBED,), jnp.float32),
            "ls1": jnp.full((EMBED,), LS_INIT, jnp.float32),
            "norm2_g": jnp.ones((EMBED,), jnp.float32),
            "norm2_b": jnp.zeros((EMBED,), jnp.float32),
            "fc1_w": nrm((EMBED, MLP_HIDDEN)),
            "fc1_b": jnp.zeros((MLP_HIDDEN,), jnp.float32),
            "fc2_w": nrm((MLP_HIDDEN, EMBED)),
            "fc2_b": jnp.zeros((EMBED,), jnp.float32),
            "ls2": jnp.full((EMBED,), LS_INIT, jnp.float32),
        }
        params["blocks"].append(blk)
    return params


# ---------------------------------------------------------------------------
# Layout plumbing (pure reshape/transpose/weight-folding on host) + encode
# ---------------------------------------------------------------------------
def _extract_patches(x):
    # x: (N, C, H, W) -> (N*Hp*Wp, C*P*P); row-major patches, channel-major cols
    # (matches Conv2d patch-embed + flatten(2)).
    N, C, H, W = x.shape
    Hp, Wp = H // PATCH, W // PATCH
    xp = x.reshape(N, C, Hp, PATCH, Wp, PATCH)
    xp = xp.transpose(0, 2, 4, 1, 3, 5)
    return xp.reshape(N * Hp * Wp, C * PATCH * PATCH), N, Hp * Wp


def encode_pallas(x, params):
    N, C, H, W = x.shape
    num_patches = (H // PATCH) * (W // PATCH)
    seq = num_patches + NUM_PREFIX
    seq_pad = ((seq + 7) // 8) * 8          # sublane-aligned per-image slab
    hp = jax.lax.Precision.HIGHEST
    mmdt = MATMUL_DTYPE

    # Fold Denormalize∘Normalize (per-channel affine) into patch-embed weights:
    #   (x*s + o) @ W + b  ==  x @ (s*W) + (o @ W + b)        (exact)
    ds = jnp.asarray(DE_STD, jnp.float32)
    dm = jnp.asarray(DE_MEAN, jnp.float32)
    nm = jnp.asarray(N_MEAN, jnp.float32)
    ns = jnp.asarray(N_STD, jnp.float32)
    pscale = jnp.repeat(ds / ns, PATCH * PATCH)            # (PDIM,), channel-major
    poff = jnp.repeat((dm - nm) / ns, PATCH * PATCH)       # (PDIM,)
    pw2d = params["patch_w"].reshape(EMBED, PDIM).T        # (PDIM, EMBED)
    pwf = (pw2d * pscale[:, None]).astype(mmdt)
    pbf = jnp.einsum("p,pe->e", poff, pw2d, precision=hp) + params["patch_b"]

    # Per-image, sublane-padded token slab.  Layout per image (seq_pad rows):
    #   rows [0, num_patches)  : patch tokens (the output rows, aligned at 0)
    #   row  num_patches       : cls token
    #   rows [seq, seq_pad)    : zero padding (masked out of attention keys)
    patches, _, _ = _extract_patches(x)                    # (N*num_patches, PDIM)
    patches = patches.reshape(N, num_patches, PDIM)
    patches_pad = jnp.pad(
        patches, ((0, 0), (0, seq_pad - num_patches), (0, 0))).astype(mmdt)

    pos = params["pos_embed"].reshape(seq, EMBED)
    cls = params["cls_token"].reshape(EMBED)
    add = jnp.zeros((seq_pad, EMBED), jnp.float32)
    add = add.at[0:num_patches].set(pos[NUM_PREFIX:] + pbf)   # patch rows (+bias)
    add = add.at[num_patches].set(cls + pos[0])               # cls row (no bias)

    # Stack per-block weights with depth leading and heads on a leading axis
    # (no lane-offset head slicing inside the kernel).
    blocks = params["blocks"]
    stk = lambda f: jnp.stack([f(b) for b in blocks])
    vec = lambda k: stk(lambda b: b[k].reshape(1, -1))                    # (D,1,c)
    qkv_w = stk(lambda b: b["qkv_w"].reshape(EMBED, 3, HEADS, HEAD_DIM)
                .transpose(1, 2, 0, 3)
                .reshape(3 * HEADS, EMBED, HEAD_DIM)).astype(mmdt)        # (D,3H,E,hd)
    qkv_b = stk(lambda b: b["qkv_b"].reshape(3 * HEADS, 1, HEAD_DIM))     # (D,3H,1,hd)
    proj_w = stk(lambda b: b["proj_w"].reshape(HEADS, HEAD_DIM, EMBED)).astype(mmdt)
    fc1_w = stk(lambda b: b["fc1_w"]).astype(mmdt)                        # (D,E,4E)
    fc2_w = stk(lambda b: b["fc2_w"]).astype(mmdt)                        # (D,4E,E)

    const_args = [add, pwf]
    depth_args = [vec("norm1_g"), vec("norm1_b"), qkv_w, qkv_b, proj_w,
                  vec("proj_b"), vec("ls1"), vec("norm2_g"), vec("norm2_b"),
                  fc1_w, vec("fc1_b"), fc2_w, vec("fc2_b"), vec("ls2")]
    final_args = [params["norm_g"].reshape(1, EMBED),
                  params["norm_b"].reshape(1, EMBED)]
    args = [patches_pad] + const_args + depth_args + final_args

    def const_spec(shape):
        nd = len(shape)
        return pl.BlockSpec(shape, lambda n, d: (0,) * nd)

    def depth_spec(shape):
        nd = len(shape) - 1
        return pl.BlockSpec((1,) + tuple(shape[1:]),
                            lambda n, d: (d,) + (0,) * nd)

    in_specs = ([pl.BlockSpec((1, seq_pad, PDIM), lambda n, d: (n, 0, 0))]
                + [const_spec(a.shape) for a in const_args]
                + [depth_spec(a.shape) for a in depth_args]
                + [const_spec(a.shape) for a in final_args])

    out = pl.pallas_call(
        functools.partial(
            _encoder_kernel,
            seq=seq, seq_pad=seq_pad, num_patches=num_patches,
            heads=HEADS, scale=HEAD_DIM ** -0.5, eps=LN_EPS),
        grid=(N, DEPTH),
        in_specs=in_specs,
        out_specs=pl.BlockSpec((1, num_patches, EMBED), lambda n, d: (n, 0, 0)),
        out_shape=jax.ShapeDtypeStruct((N, num_patches, EMBED), jnp.float32),
        scratch_shapes=[pltpu.VMEM((seq_pad, EMBED), jnp.float32)],  # resident h
        compiler_params=pltpu.CompilerParams(
            dimension_semantics=("parallel", "arbitrary")),
    )(*args)
    return out


# ---------------------------------------------------------------------------
# Pure-JAX reference (original op order, f32, no folding) for validation
# ---------------------------------------------------------------------------
def encode_ref(x, params):
    N, C, H, W = x.shape
    hp = jax.lax.Precision.HIGHEST
    dm = jnp.asarray(DE_MEAN, jnp.float32).reshape(1, C, 1, 1)
    ds = jnp.asarray(DE_STD, jnp.float32).reshape(1, C, 1, 1)
    nm = jnp.asarray(N_MEAN, jnp.float32).reshape(1, C, 1, 1)
    ns = jnp.asarray(N_STD, jnp.float32).reshape(1, C, 1, 1)
    xr = ((x * ds + dm) - nm) / ns

    patches, _, num_patches = _extract_patches(xr)
    w2d = params["patch_w"].reshape(EMBED, PDIM).T
    tok = jnp.dot(patches, w2d, precision=hp) + params["patch_b"]
    tok = tok.reshape(N, num_patches, EMBED)

    cls = jnp.broadcast_to(params["cls_token"], (N, 1, EMBED))
    seq = num_patches + NUM_PREFIX
    h = jnp.concatenate([cls, tok], axis=1) + params["pos_embed"]
    h = h.reshape(N * seq, EMBED)

    def ln(v, g, b):
        mu = jnp.mean(v, axis=-1, keepdims=True)
        vc = v - mu
        var = jnp.mean(vc * vc, axis=-1, keepdims=True)
        return vc * jax.lax.rsqrt(var + LN_EPS) * g + b

    scale = HEAD_DIM ** -0.5
    for blk in params["blocks"]:
        y = ln(h, blk["norm1_g"], blk["norm1_b"])
        qkv = jnp.dot(y, blk["qkv_w"], precision=hp) + blk["qkv_b"]
        qkv = qkv.reshape(N, seq, 3, HEADS, HEAD_DIM)
        q = qkv[:, :, 0].transpose(0, 2, 1, 3)
        k = qkv[:, :, 1].transpose(0, 2, 1, 3)
        v = qkv[:, :, 2].transpose(0, 2, 1, 3)
        s = jnp.einsum("nhqd,nhkd->nhqk", q, k, precision=hp) * scale
        p = jax.nn.softmax(s, axis=-1)
        a = jnp.einsum("nhqk,nhkd->nhqd", p, v, precision=hp)
        a = a.transpose(0, 2, 1, 3).reshape(N * seq, EMBED)
        a = jnp.dot(a, blk["proj_w"], precision=hp) + blk["proj_b"]
        h = h + a * blk["ls1"]

        y = ln(h, blk["norm2_g"], blk["norm2_b"])
        y = jax.nn.gelu(jnp.dot(y, blk["fc1_w"], precision=hp) + blk["fc1_b"],
                        approximate=True)
        y = jnp.dot(y, blk["fc2_w"], precision=hp) + blk["fc2_b"]
        h = h + y * blk["ls2"]

    h = ln(h, params["norm_g"], params["norm_b"]).reshape(N, seq, EMBED)
    return h[:, NUM_PREFIX:]


# ---------------------------------------------------------------------------
if __name__ == "__main__":
    key = jax.random.PRNGKey(0)
    k_x, k_p = jax.random.split(key)
    x = jax.random.normal(k_x, (2, C_IN, IMG, IMG), dtype=jnp.float32)  # NCHW
    params = init_params(k_p)

    out = jax.block_until_ready(encode_pallas(x, params))
    ref = jax.block_until_ready(encode_ref(x, params))

    assert out.shape == (2, (IMG // PATCH) ** 2, EMBED), out.shape
    # Tolerance covers bf16 MXU operands in the kernel vs the f32 reference
    # (~0.5% relative error, dominated by the patch-embed matmul).
    np.testing.assert_allclose(np.asarray(out), np.asarray(ref),
                               rtol=3e-2, atol=3e-2)
    print("KERNEL_OK")
</pallas_src>

<mosaic_0001>
module attributes {stable_mosaic.version = 11 : i64} {
  func.func @_encoder_kernel(%arg0: i32, %arg1: i32, %arg2: memref<1x8x192xbf16, #tpu.memory_space<vmem>>, %arg3: memref<8x32xf32, #tpu.memory_space<vmem>>, %arg4: memref<192x32xbf16, #tpu.memory_space<vmem>>, %arg5: memref<1x1x32xf32, #tpu.memory_space<vmem>>, %arg6: memref<1x1x32xf32, #tpu.memory_space<vmem>>, %arg7: memref<1x12x32x8xbf16, #tpu.memory_space<vmem>>, %arg8: memref<1x12x1x8xf32, #tpu.memory_space<vmem>>, %arg9: memref<1x4x8x32xbf16, #tpu.memory_space<vmem>>, %arg10: memref<1x1x32xf32, #tpu.memory_space<vmem>>, %arg11: memref<1x1x32xf32, #tpu.memory_space<vmem>>, %arg12: memref<1x1x32xf32, #tpu.memory_space<vmem>>, %arg13: memref<1x1x32xf32, #tpu.memory_space<vmem>>, %arg14: memref<1x32x128xbf16, #tpu.memory_space<vmem>>, %arg15: memref<1x1x128xf32, #tpu.memory_space<vmem>>, %arg16: memref<1x128x32xbf16, #tpu.memory_space<vmem>>, %arg17: memref<1x1x32xf32, #tpu.memory_space<vmem>>, %arg18: memref<1x1x32xf32, #tpu.memory_space<vmem>>, %arg19: memref<1x32xf32, #tpu.memory_space<vmem>>, %arg20: memref<1x32xf32, #tpu.memory_space<vmem>>, %arg21: memref<1x4x32xf32, #tpu.memory_space<vmem>>, %arg22: memref<8x32xf32, #tpu.memory_space<vmem>>) attributes {dimension_semantics = [#tpu.dimension_semantics<parallel>, #tpu.dimension_semantics<arbitrary>], iteration_bounds = array<i64: 2, 2>, scalar_prefetch = 0 : i64, scratch_operands = 1 : i64, tpu.core_type = #tpu.core_type<tc>, window_params = [{transform_indices = @transform_0, window_bounds = array<i64: 1, 8, 192>}, {pipeline_mode = #tpu.pipeline_mode<synchronous>, transform_indices = @transform_1, window_bounds = array<i64: 8, 32>}, {pipeline_mode = #tpu.pipeline_mode<synchronous>, transform_indices = @transform_2, window_bounds = array<i64: 192, 32>}, {transform_indices = @transform_3, window_bounds = array<i64: 1, 1, 32>}, {transform_indices = @transform_4, window_bounds = array<i64: 1, 1, 32>}, {transform_indices = @transform_5, window_bounds = array<i64: 1, 12, 32, 8>}, {transform_indices = @transform_6, window_bounds = array<i64: 1, 12, 1, 8>}, {transform_indices = @transform_7, window_bounds = array<i64: 1, 4, 8, 32>}, {transform_indices = @transform_8, window_bounds = array<i64: 1, 1, 32>}, {transform_indices = @transform_9, window_bounds = array<i64: 1, 1, 32>}, {transform_indices = @transform_10, window_bounds = array<i64: 1, 1, 32>}, {transform_indices = @transform_11, window_bounds = array<i64: 1, 1, 32>}, {transform_indices = @transform_12, window_bounds = array<i64: 1, 32, 128>}, {transform_indices = @transform_13, window_bounds = array<i64: 1, 1, 128>}, {transform_indices = @transform_14, window_bounds = array<i64: 1, 128, 32>}, {transform_indices = @transform_15, window_bounds = array<i64: 1, 1, 32>}, {transform_indices = @transform_16, window_bounds = array<i64: 1, 1, 32>}, {pipeline_mode = #tpu.pipeline_mode<synchronous>, transform_indices = @transform_17, window_bounds = array<i64: 1, 32>}, {pipeline_mode = #tpu.pipeline_mode<synchronous>, transform_indices = @transform_18, window_bounds = array<i64: 1, 32>}, {transform_indices = @transform_19, window_bounds = array<i64: 1, 4, 32>}]} {
    %c0_i32 = arith.constant 0 : i32
    %0 = arith.cmpi eq, %arg1, %c0_i32 : i32
    %1 = arith.extui %0 : i1 to i32
    %c0_i32_0 = arith.constant 0 : i32
    %2 = arith.cmpi ne, %1, %c0_i32_0 : i32
    scf.if %2 {
      %c0_195 = arith.constant 0 : index
      %c0_196 = arith.constant 0 : index
      %c0_197 = arith.constant 0 : index
      %288 = vector.load %arg2[%c0_195, %c0_196, %c0_197] : memref<1x8x192xbf16, #tpu.memory_space<vmem>>, vector<1x8x192xbf16>
      %289 = vector.shape_cast %288 : vector<1x8x192xbf16> to vector<8x192xbf16>
      %c0_198 = arith.constant 0 : index
      %c0_199 = arith.constant 0 : index
      %290 = vector.load %arg4[%c0_198, %c0_199] : memref<192x32xbf16, #tpu.memory_space<vmem>>, vector<192x32xbf16>
      %cst_200 = arith.constant dense<0.000000e+00> : vector<8x32xf32>
      %291 = tpu.matmul %289, %290, %cst_200 {dimension_numbers = #tpu.dot_dimension_numbers<[1], [0], [0], [1], [0, 0, 1, 1], [], []>} : vector<8x192xbf16>, vector<192x32xbf16>, vector<8x32xf32> -> vector<8x32xf32>
      %c0_201 = arith.constant 0 : index
      %c0_202 = arith.constant 0 : index
      %292 = vector.load %arg3[%c0_201, %c0_202] : memref<8x32xf32, #tpu.memory_space<vmem>>, vector<8x32xf32>
      %293 = arith.addf %291, %292 : vector<8x32xf32>
      %c0_203 = arith.constant 0 : index
      %c0_204 = arith.constant 0 : index
      %294 = vector.load %arg22[%c0_203, %c0_204] : memref<8x32xf32, #tpu.memory_space<vmem>>, vector<8x32xf32>
      tpu.vector_store %arg22[%c0_203, %c0_204], %293 {strides = array<i32>} : memref<8x32xf32, #tpu.memory_space<vmem>>, vector<8x32xf32>,
    } else {
    }
    %c0 = arith.constant 0 : index
    %c0_1 = arith.constant 0 : index
    %3 = vector.load %arg22[%c0, %c0_1] : memref<8x32xf32, #tpu.memory_space<vmem>>, vector<8x32xf32>
    %c0_2 = arith.constant 0 : index
    %c0_3 = arith.constant 0 : index
    %c0_4 = arith.constant 0 : index
    %4 = vector.load %arg5[%c0_2, %c0_3, %c0_4] : memref<1x1x32xf32, #tpu.memory_space<vmem>>, vector<1x1x32xf32>
    %5 = vector.shape_cast %4 : vector<1x1x32xf32> to vector<1x32xf32>
    %c0_5 = arith.constant 0 : index
    %c0_6 = arith.constant 0 : index
    %c0_7 = arith.constant 0 : index
    %6 = vector.load %arg6[%c0_5, %c0_6, %c0_7] : memref<1x1x32xf32, #tpu.memory_space<vmem>>, vector<1x1x32xf32>
    %7 = vector.shape_cast %6 : vector<1x1x32xf32> to vector<1x32xf32>
    %cst = arith.constant dense<0.000000e+00> : vector<8xf32>
    %8 = vector.multi_reduction <add>, %3, %cst [1] : vector<8x32xf32> to vector<8xf32>
    %9 = vector.shape_cast %8 : vector<8xf32> to vector<8x1xf32>
    %cst_8 = arith.constant 3.200000e+01 : f32
    %10 = vector.broadcast %cst_8 : f32 to vector<8x1xf32>
    %11 = arith.divf %9, %10 : vector<8x1xf32>
    %12 = vector.broadcast %11 : vector<8x1xf32> to vector<8x32xf32>
    %13 = arith.subf %3, %12 : vector<8x32xf32>
    %14 = arith.mulf %13, %13 : vector<8x32xf32>
    %cst_9 = arith.constant dense<0.000000e+00> : vector<8xf32>
    %15 = vector.multi_reduction <add>, %14, %cst_9 [1] : vector<8x32xf32> to vector<8xf32>
    %16 = vector.shape_cast %15 : vector<8xf32> to vector<8x1xf32>
    %cst_10 = arith.constant 3.200000e+01 : f32
    %17 = vector.broadcast %cst_10 : f32 to vector<8x1xf32>
    %18 = arith.divf %16, %17 : vector<8x1xf32>
    %cst_11 = arith.constant 9.99999997E-7 : f32
    %19 = vector.broadcast %cst_11 : f32 to vector<8x1xf32>
    %20 = arith.addf %18, %19 : vector<8x1xf32>
    %21 = math.rsqrt %20 : vector<8x1xf32>
    %22 = vector.broadcast %21 : vector<8x1xf32> to vector<8x32xf32>
    %23 = arith.mulf %13, %22 : vector<8x32xf32>
    %24 = vector.broadcast %5 : vector<1x32xf32> to vector<8x32xf32>
    %25 = arith.mulf %23, %24 : vector<8x32xf32>
    %26 = vector.broadcast %7 : vector<1x32xf32> to vector<8x32xf32>
    %27 = arith.addf %25, %26 : vector<8x32xf32>
    %28 = arith.truncf %27 : vector<8x32xf32> to vector<8x32xbf16>
    %29 = tpu.iota {dimensions = array<i32: 1>} : vector<8x8xi32>
    %c5_i32 = arith.constant 5 : i32
    %30 = vector.broadcast %c5_i32 : i32 to vector<8x8xi32>
    %31 = arith.cmpi slt, %29, %30 : vector<8x8xi32>
    %cst_12 = arith.constant 0.000000e+00 : f32
    %32 = vector.broadcast %cst_12 : f32 to vector<8x32xf32>
    %c0_13 = arith.constant 0 : index
    %c0_14 = arith.constant 0 : index
    %c0_15 = arith.constant 0 : index
    %c0_16 = arith.constant 0 : index
    %33 = vector.load %arg7[%c0_13, %c0_14, %c0_15, %c0_16] : memref<1x12x32x8xbf16, #tpu.memory_space<vmem>>, vector<1x1x32x8xbf16>
    %34 = vector.shape_cast %33 : vector<1x1x32x8xbf16> to vector<32x8xbf16>
    %cst_17 = arith.constant dense<0.000000e+00> : vector<8x8xf32>
    %35 = tpu.matmul %28, %34, %cst_17 {dimension_numbers = #tpu.dot_dimension_numbers<[1], [0], [0], [1], [0, 0, 1, 1], [], []>} : vector<8x32xbf16>, vector<32x8xbf16>, vector<8x8xf32> -> vector<8x8xf32>
    %c0_18 = arith.constant 0 : index
    %c0_19 = arith.constant 0 : index
    %c0_20 = arith.constant 0 : index
    %c0_21 = arith.constant 0 : index
    %36 = vector.load %arg8[%c0_18, %c0_19, %c0_20, %c0_21] : memref<1x12x1x8xf32, #tpu.memory_space<vmem>>, vector<1x1x1x8xf32>
    %37 = vector.shape_cast %36 : vector<1x1x1x8xf32> to vector<1x8xf32>
    %38 = vector.broadcast %37 : vector<1x8xf32> to vector<8x8xf32>
    %39 = arith.addf %35, %38 : vector<8x8xf32>
    %c0_22 = arith.constant 0 : index
    %c4 = arith.constant 4 : index
    %c0_23 = arith.constant 0 : index
    %c0_24 = arith.constant 0 : index
    %40 = vector.load %arg7[%c0_22, %c4, %c0_23, %c0_24] : memref<1x12x32x8xbf16, #tpu.memory_space<vmem>>, vector<1x1x32x8xbf16>
    %41 = vector.shape_cast %40 : vector<1x1x32x8xbf16> to vector<32x8xbf16>
    %cst_25 = arith.constant dense<0.000000e+00> : vector<8x8xf32>
    %42 = tpu.matmul %28, %41, %cst_25 {dimension_numbers = #tpu.dot_dimension_numbers<[1], [0], [0], [1], [0, 0, 1, 1], [], []>} : vector<8x32xbf16>, vector<32x8xbf16>, vector<8x8xf32> -> vector<8x8xf32>
    %c0_26 = arith.constant 0 : index
    %c4_27 = arith.constant 4 : index
    %c0_28 = arith.constant 0 : index
    %c0_29 = arith.constant 0 : index
    %43 = vector.load %arg8[%c0_26, %c4_27, %c0_28, %c0_29] : memref<1x12x1x8xf32, #tpu.memory_space<vmem>>, vector<1x1x1x8xf32>
    %44 = vector.shape_cast %43 : vector<1x1x1x8xf32> to vector<1x8xf32>
    %45 = vector.broadcast %44 : vector<1x8xf32> to vector<8x8xf32>
    %46 = arith.addf %42, %45 : vector<8x8xf32>
    %c0_30 = arith.constant 0 : index
    %c8 = arith.constant 8 : index
    %c0_31 = arith.constant 0 : index
    %c0_32 = arith.constant 0 : index
    %47 = vector.load %arg7[%c0_30, %c8, %c0_31, %c0_32] : memref<1x12x32x8xbf16, #tpu.memory_space<vmem>>, vector<1x1x32x8xbf16>
    %48 = vector.shape_cast %47 : vector<1x1x32x8xbf16> to vector<32x8xbf16>
    %cst_33 = arith.constant dense<0.000000e+00> : vector<8x8xf32>
    %49 = tpu.matmul %28, %48, %cst_33 {dimension_numbers = #tpu.dot_dimension_numbers<[1], [0], [0], [1], [0, 0, 1, 1], [], []>} : vector<8x32xbf16>, vector<32x8xbf16>, vector<8x8xf32> -> vector<8x8xf32>
    %c0_34 = arith.constant 0 : index
    %c8_35 = arith.constant 8 : index
    %c0_36 = arith.constant 0 : index
    %c0_37 = arith.constant 0 : index
    %50 = vector.load %arg8[%c0_34, %c8_35, %c0_36, %c0_37] : memref<1x12x1x8xf32, #tpu.memory_space<vmem>>, vector<1x1x1x8xf32>
    %51 = vector.shape_cast %50 : vector<1x1x1x8xf32> to vector<1x8xf32>
    %52 = vector.broadcast %51 : vector<1x8xf32> to vector<8x8xf32>
    %53 = arith.addf %49, %52 : vector<8x8xf32>
    %54 = arith.truncf %39 : vector<8x8xf32> to vector<8x8xbf16>
    %55 = arith.truncf %46 : vector<8x8xf32> to vector<8x8xbf16>
    %cst_38 = arith.constant dense<0.000000e+00> : vector<8x8xf32>
    %56 = tpu.matmul %54, %55, %cst_38 {dimension_numbers = #tpu.dot_dimension_numbers<[1], [1], [0], [0], [0, 0, 1, 0], [], []>} : vector<8x8xbf16>, vector<8x8xbf16>, vector<8x8xf32> -> vector<8x8xf32>
    %cst_39 = arith.constant 0.353553385 : f32
    %57 = vector.broadcast %cst_39 : f32 to vector<8x8xf32>
    %58 = arith.mulf %56, %57 : vector<8x8xf32>
    %cst_40 = arith.constant -1.000000e+30 : f32
    %59 = vector.broadcast %cst_40 : f32 to vector<8x8xf32>
    %60 = arith.select %31, %58, %59 : vector<8x8xi1>, vector<8x8xf32>
    %cst_41 = arith.constant dense<0xFF800000> : vector<8xf32>
    %61 = vector.multi_reduction <maximumf>, %60, %cst_41 [1] : vector<8x8xf32> to vector<8xf32>
    %62 = vector.shape_cast %61 : vector<8xf32> to vector<8x1xf32>
    %63 = vector.broadcast %62 : vector<8x1xf32> to vector<8x8xf32>
    %64 = arith.subf %60, %63 : vector<8x8xf32>
    %65 = math.exp %64 : vector<8x8xf32>
    %cst_42 = arith.constant dense<0.000000e+00> : vector<8xf32>
    %66 = vector.multi_reduction <add>, %65, %cst_42 [1] : vector<8x8xf32> to vector<8xf32>
    %67 = vector.shape_cast %66 : vector<8xf32> to vector<8x1xf32>
    %68 = tpu.reciprocal %67 : vector<8x1xf32> -> vector<8x1xf32>
    %69 = vector.broadcast %68 : vector<8x1xf32> to vector<8x8xf32>
    %70 = arith.mulf %65, %69 : vector<8x8xf32>
    %71 = arith.truncf %70 : vector<8x8xf32> to vector<8x8xbf16>
    %72 = arith.truncf %53 : vector<8x8xf32> to vector<8x8xbf16>
    %cst_43 = arith.constant dense<0.000000e+00> : vector<8x8xf32>
    %73 = tpu.matmul %71, %72, %cst_43 {dimension_numbers = #tpu.dot_dimension_numbers<[1], [0], [0], [1], [0, 0, 1, 1], [], []>} : vector<8x8xbf16>, vector<8x8xbf16>, vector<8x8xf32> -> vector<8x8xf32>
    %74 = arith.truncf %73 : vector<8x8xf32> to vector<8x8xbf16>
    %c0_44 = arith.constant 0 : index
    %c0_45 = arith.constant 0 : index
    %c0_46 = arith.constant 0 : index
    %c0_47 = arith.constant 0 : index
    %75 = vector.load %arg9[%c0_44, %c0_45, %c0_46, %c0_47] : memref<1x4x8x32xbf16, #tpu.memory_space<vmem>>, vector<1x1x8x32xbf16>
    %76 = vector.shape_cast %75 : vector<1x1x8x32xbf16> to vector<8x32xbf16>
    %cst_48 = arith.constant dense<0.000000e+00> : vector<8x32xf32>
    %77 = tpu.matmul %74, %76, %cst_48 {dimension_numbers = #tpu.dot_dimension_numbers<[1], [0], [0], [1], [0, 0, 1, 1], [], []>} : vector<8x8xbf16>, vector<8x32xbf16>, vector<8x32xf32> -> vector<8x32xf32>
    %78 = arith.addf %32, %77 : vector<8x32xf32>
    %c0_49 = arith.constant 0 : index
    %c1 = arith.constant 1 : index
    %c0_50 = arith.constant 0 : index
    %c0_51 = arith.constant 0 : index
    %79 = vector.load %arg7[%c0_49, %c1, %c0_50, %c0_51] : memref<1x12x32x8xbf16, #tpu.memory_space<vmem>>, vector<1x1x32x8xbf16>
    %80 = vector.shape_cast %79 : vector<1x1x32x8xbf16> to vector<32x8xbf16>
    %cst_52 = arith.constant dense<0.000000e+00> : vector<8x8xf32>
    %81 = tpu.matmul %28, %80, %cst_52 {dimension_numbers = #tpu.dot_dimension_numbers<[1], [0], [0], [1], [0, 0, 1, 1], [], []>} : vector<8x32xbf16>, vector<32x8xbf16>, vector<8x8xf32> -> vector<8x8xf32>
    %c0_53 = arith.constant 0 : index
    %c1_54 = arith.constant 1 : index
    %c0_55 = arith.constant 0 : index
    %c0_56 = arith.constant 0 : index
    %82 = vector.load %arg8[%c0_53, %c1_54, %c0_55, %c0_56] : memref<1x12x1x8xf32, #tpu.memory_space<vmem>>, vector<1x1x1x8xf32>
    %83 = vector.shape_cast %82 : vector<1x1x1x8xf32> to vector<1x8xf32>
    %84 = vector.broadcast %83 : vector<1x8xf32> to vector<8x8xf32>
    %85 = arith.addf %81, %84 : vector<8x8xf32>
    %c0_57 = arith.constant 0 : index
    %c5 = arith.constant 5 : index
    %c0_58 = arith.constant 0 : index
    %c0_59 = arith.constant 0 : index
    %86 = vector.load %arg7[%c0_57, %c5, %c0_58, %c0_59] : memref<1x12x32x8xbf16, #tpu.memory_space<vmem>>, vector<1x1x32x8xbf16>
    %87 = vector.shape_cast %86 : vector<1x1x32x8xbf16> to vector<32x8xbf16>
    %cst_60 = arith.constant dense<0.000000e+00> : vector<8x8xf32>
    %88 = tpu.matmul %28, %87, %cst_60 {dimension_numbers = #tpu.dot_dimension_numbers<[1], [0], [0], [1], [0, 0, 1, 1], [], []>} : vector<8x32xbf16>, vector<32x8xbf16>, vector<8x8xf32> -> vector<8x8xf32>
    %c0_61 = arith.constant 0 : index
    %c5_62 = arith.constant 5 : index
    %c0_63 = arith.constant 0 : index
    %c0_64 = arith.constant 0 : index
    %89 = vector.load %arg8[%c0_61, %c5_62, %c0_63, %c0_64] : memref<1x12x1x8xf32, #tpu.memory_space<vmem>>, vector<1x1x1x8xf32>
    %90 = vector.shape_cast %89 : vector<1x1x1x8xf32> to vector<1x8xf32>
    %91 = vector.broadcast %90 : vector<1x8xf32> to vector<8x8xf32>
    %92 = arith.addf %88, %91 : vector<8x8xf32>
    %c0_65 = arith.constant 0 : index
    %c9 = arith.constant 9 : index
    %c0_66 = arith.constant 0 : index
    %c0_67 = arith.constant 0 : index
    %93 = vector.load %arg7[%c0_65, %c9, %c0_66, %c0_67] : memref<1x12x32x8xbf16, #tpu.memory_space<vmem>>, vector<1x1x32x8xbf16>
    %94 = vector.shape_cast %93 : vector<1x1x32x8xbf16> to vector<32x8xbf16>
    %cst_68 = arith.constant dense<0.000000e+00> : vector<8x8xf32>
    %95 = tpu.matmul %28, %94, %cst_68 {dimension_numbers = #tpu.dot_dimension_numbers<[1], [0], [0], [1], [0, 0, 1, 1], [], []>} : vector<8x32xbf16>, vector<32x8xbf16>, vector<8x8xf32> -> vector<8x8xf32>
    %c0_69 = arith.constant 0 : index
    %c9_70 = arith.constant 9 : index
    %c0_71 = arith.constant 0 : index
    %c0_72 = arith.constant 0 : index
    %96 = vector.load %arg8[%c0_69, %c9_70, %c0_71, %c0_72] : memref<1x12x1x8xf32, #tpu.memory_space<vmem>>, vector<1x1x1x8xf32>
    %97 = vector.shape_cast %96 : vector<1x1x1x8xf32> to vector<1x8xf32>
    %98 = vector.broadcast %97 : vector<1x8xf32> to vector<8x8xf32>
    %99 = arith.addf %95, %98 : vector<8x8xf32>
    %100 = arith.truncf %85 : vector<8x8xf32> to vector<8x8xbf16>
    %101 = arith.truncf %92 : vector<8x8xf32> to vector<8x8xbf16>
    %cst_73 = arith.constant dense<0.000000e+00> : vector<8x8xf32>
    %102 = tpu.matmul %100, %101, %cst_73 {dimension_numbers = #tpu.dot_dimension_numbers<[1], [1], [0], [0], [0, 0, 1, 0], [], []>} : vector<8x8xbf16>, vector<8x8xbf16>, vector<8x8xf32> -> vector<8x8xf32>
    %cst_74 = arith.constant 0.353553385 : f32
    %103 = vector.broadcast %cst_74 : f32 to vector<8x8xf32>
    %104 = arith.mulf %102, %103 : vector<8x8xf32>
    %cst_75 = arith.constant -1.000000e+30 : f32
    %105 = vector.broadcast %cst_75 : f32 to vector<8x8xf32>
    %106 = arith.select %31, %104, %105 : vector<8x8xi1>, vector<8x8xf32>
    %cst_76 = arith.constant dense<0xFF800000> : vector<8xf32>
    %107 = vector.multi_reduction <maximumf>, %106, %cst_76 [1] : vector<8x8xf32> to vector<8xf32>
    %108 = vector.shape_cast %107 : vector<8xf32> to vector<8x1xf32>
    %109 = vector.broadcast %108 : vector<8x1xf32> to vector<8x8xf32>
    %110 = arith.subf %106, %109 : vector<8x8xf32>
    %111 = math.exp %110 : vector<8x8xf32>
    %cst_77 = arith.constant dense<0.000000e+00> : vector<8xf32>
    %112 = vector.multi_reduction <add>, %111, %cst_77 [1] : vector<8x8xf32> to vector<8xf32>
    %113 = vector.shape_cast %112 : vector<8xf32> to vector<8x1xf32>
    %114 = tpu.reciprocal %113 : vector<8x1xf32> -> vector<8x1xf32>
    %115 = vector.broadcast %114 : vector<8x1xf32> to vector<8x8xf32>
    %116 = arith.mulf %111, %115 : vector<8x8xf32>
    %117 = arith.truncf %116 : vector<8x8xf32> to vector<8x8xbf16>
    %118 = arith.truncf %99 : vector<8x8xf32> to vector<8x8xbf16>
    %cst_78 = arith.constant dense<0.000000e+00> : vector<8x8xf32>
    %119 = tpu.matmul %117, %118, %cst_78 {dimension_numbers = #tpu.dot_dimension_numbers<[1], [0], [0], [1], [0, 0, 1, 1], [], []>} : vector<8x8xbf16>, vector<8x8xbf16>, vector<8x8xf32> -> vector<8x8xf32>
    %120 = arith.truncf %119 : vector<8x8xf32> to vector<8x8xbf16>
    %c0_79 = arith.constant 0 : index
    %c1_80 = arith.constant 1 : index
    %c0_81 = arith.constant 0 : index
    %c0_82 = arith.constant 0 : index
    %121 = vector.load %arg9[%c0_79, %c1_80, %c0_81, %c0_82] : memref<1x4x8x32xbf16, #tpu.memory_space<vmem>>, vector<1x1x8x32xbf16>
    %122 = vector.shape_cast %121 : vector<1x1x8x32xbf16> to vector<8x32xbf16>
    %cst_83 = arith.constant dense<0.000000e+00> : vector<8x32xf32>
    %123 = tpu.matmul %120, %122, %cst_83 {dimension_numbers = #tpu.dot_dimension_numbers<[1], [0], [0], [1], [0, 0, 1, 1], [], []>} : vector<8x8xbf16>, vector<8x32xbf16>, vector<8x32xf32> -> vector<8x32xf32>
    %124 = arith.addf %78, %123 : vector<8x32xf32>
    %c0_84 = arith.constant 0 : index
    %c2 = arith.constant 2 : index
    %c0_85 = arith.constant 0 : index
    %c0_86 = arith.constant 0 : index
    %125 = vector.load %arg7[%c0_84, %c2, %c0_85, %c0_86] : memref<1x12x32x8xbf16, #tpu.memory_space<vmem>>, vector<1x1x32x8xbf16>
    %126 = vector.shape_cast %125 : vector<1x1x32x8xbf16> to vector<32x8xbf16>
    %cst_87 = arith.constant dense<0.000000e+00> : vector<8x8xf32>
    %127 = tpu.matmul %28, %126, %cst_87 {dimension_numbers = #tpu.dot_dimension_numbers<[1], [0], [0], [1], [0, 0, 1, 1], [], []>} : vector<8x32xbf16>, vector<32x8xbf16>, vector<8x8xf32> -> vector<8x8xf32>
    %c0_88 = arith.constant 0 : index
    %c2_89 = arith.constant 2 : index
    %c0_90 = arith.constant 0 : index
    %c0_91 = arith.constant 0 : index
    %128 = vector.load %arg8[%c0_88, %c2_89, %c0_90, %c0_91] : memref<1x12x1x8xf32, #tpu.memory_space<vmem>>, vector<1x1x1x8xf32>
    %129 = vector.shape_cast %128 : vector<1x1x1x8xf32> to vector<1x8xf32>
    %130 = vector.broadcast %129 : vector<1x8xf32> to vector<8x8xf32>
    %131 = arith.addf %127, %130 : vector<8x8xf32>
    %c0_92 = arith.constant 0 : index
    %c6 = arith.constant 6 : index
    %c0_93 = arith.constant 0 : index
    %c0_94 = arith.constant 0 : index
    %132 = vector.load %arg7[%c0_92, %c6, %c0_93, %c0_94] : memref<1x12x32x8xbf16, #tpu.memory_space<vmem>>, vector<1x1x32x8xbf16>
    %133 = vector.shape_cast %132 : vector<1x1x32x8xbf16> to vector<32x8xbf16>
    %cst_95 = arith.constant dense<0.000000e+00> : vector<8x8xf32>
    %134 = tpu.matmul %28, %133, %cst_95 {dimension_numbers = #tpu.dot_dimension_numbers<[1], [0], [0], [1], [0, 0, 1, 1], [], []>} : vector<8x32xbf16>, vector<32x8xbf16>, vector<8x8xf32> -> vector<8x8xf32>
    %c0_96 = arith.constant 0 : index
    %c6_97 = arith.constant 6 : index
    %c0_98 = arith.constant 0 : index
    %c0_99 = arith.constant 0 : index
    %135 = vector.load %arg8[%c0_96, %c6_97, %c0_98, %c0_99] : memref<1x12x1x8xf32, #tpu.memory_space<vmem>>, vector<1x1x1x8xf32>
    %136 = vector.shape_cast %135 : vector<1x1x1x8xf32> to vector<1x8xf32>
    %137 = vector.broadcast %136 : vector<1x8xf32> to vector<8x8xf32>
    %138 = arith.addf %134, %137 : vector<8x8xf32>
    %c0_100 = arith.constant 0 : index
    %c10 = arith.constant 10 : index
    %c0_101 = arith.constant 0 : index
    %c0_102 = arith.constant 0 : index
    %139 = vector.load %arg7[%c0_100, %c10, %c0_101, %c0_102] : memref<1x12x32x8xbf16, #tpu.memory_space<vmem>>, vector<1x1x32x8xbf16>
    %140 = vector.shape_cast %139 : vector<1x1x32x8xbf16> to vector<32x8xbf16>
    %cst_103 = arith.constant dense<0.000000e+00> : vector<8x8xf32>
    %141 = tpu.matmul %28, %140, %cst_103 {dimension_numbers = #tpu.dot_dimension_numbers<[1], [0], [0], [1], [0, 0, 1, 1], [], []>} : vector<8x32xbf16>, vector<32x8xbf16>, vector<8x8xf32> -> vector<8x8xf32>
    %c0_104 = arith.constant 0 : index
    %c10_105 = arith.constant 10 : index
    %c0_106 = arith.constant 0 : index
    %c0_107 = arith.constant 0 : index
    %142 = vector.load %arg8[%c0_104, %c10_105, %c0_106, %c0_107] : memref<1x12x1x8xf32, #tpu.memory_space<vmem>>, vector<1x1x1x8xf32>
    %143 = vector.shape_cast %142 : vector<1x1x1x8xf32> to vector<1x8xf32>
    %144 = vector.broadcast %143 : vector<1x8xf32> to vector<8x8xf32>
    %145 = arith.addf %141, %144 : vector<8x8xf32>
    %146 = arith.truncf %131 : vector<8x8xf32> to vector<8x8xbf16>
    %147 = arith.truncf %138 : vector<8x8xf32> to vector<8x8xbf16>
    %cst_108 = arith.constant dense<0.000000e+00> : vector<8x8xf32>
    %148 = tpu.matmul %146, %147, %cst_108 {dimension_numbers = #tpu.dot_dimension_numbers<[1], [1], [0], [0], [0, 0, 1, 0], [], []>} : vector<8x8xbf16>, vector<8x8xbf16>, vector<8x8xf32> -> vector<8x8xf32>
    %cst_109 = arith.constant 0.353553385 : f32
    %149 = vector.broadcast %cst_109 : f32 to vector<8x8xf32>
    %150 = arith.mulf %148, %149 : vector<8x8xf32>
    %cst_110 = arith.constant -1.000000e+30 : f32
    %151 = vector.broadcast %cst_110 : f32 to vector<8x8xf32>
    %152 = arith.select %31, %150, %151 : vector<8x8xi1>, vector<8x8xf32>
    %cst_111 = arith.constant dense<0xFF800000> : vector<8xf32>
    %153 = vector.multi_reduction <maximumf>, %152, %cst_111 [1] : vector<8x8xf32> to vector<8xf32>
    %154 = vector.shape_cast %153 : vector<8xf32> to vector<8x1xf32>
    %155 = vector.broadcast %154 : vector<8x1xf32> to vector<8x8xf32>
    %156 = arith.subf %152, %155 : vector<8x8xf32>
    %157 = math.exp %156 : vector<8x8xf32>
    %cst_112 = arith.constant dense<0.000000e+00> : vector<8xf32>
    %158 = vector.multi_reduction <add>, %157, %cst_112 [1] : vector<8x8xf32> to vector<8xf32>
    %159 = vector.shape_cast %158 : vector<8xf32> to vector<8x1xf32>
    %160 = tpu.reciprocal %159 : vector<8x1xf32> -> vector<8x1xf32>
    %161 = vector.broadcast %160 : vector<8x1xf32> to vector<8x8xf32>
    %162 = arith.mulf %157, %161 : vector<8x8xf32>
    %163 = arith.truncf %162 : vector<8x8xf32> to vector<8x8xbf16>
    %164 = arith.truncf %145 : vector<8x8xf32> to vector<8x8xbf16>
    %cst_113 = arith.constant dense<0.000000e+00> : vector<8x8xf32>
    %165 = tpu.matmul %163, %164, %cst_113 {dimension_numbers = #tpu.dot_dimension_numbers<[1], [0], [0], [1], [0, 0, 1, 1], [], []>} : vector<8x8xbf16>, vector<8x8xbf16>, vector<8x8xf32> -> vector<8x8xf32>
    %166 = arith.truncf %165 : vector<8x8xf32> to vector<8x8xbf16>
    %c0_114 = arith.constant 0 : index
    %c2_115 = arith.constant 2 : index
    %c0_116 = arith.constant 0 : index
    %c0_117 = arith.constant 0 : index
    %167 = vector.load %arg9[%c0_114, %c2_115, %c0_116, %c0_117] : memref<1x4x8x32xbf16, #tpu.memory_space<vmem>>, vector<1x1x8x32xbf16>
    %168 = vector.shape_cast %167 : vector<1x1x8x32xbf16> to vector<8x32xbf16>
    %cst_118 = arith.constant dense<0.000000e+00> : vector<8x32xf32>
    %169 = tpu.matmul %166, %168, %cst_118 {dimension_numbers = #tpu.dot_dimension_numbers<[1], [0], [0], [1], [0, 0, 1, 1], [], []>} : vector<8x8xbf16>, vector<8x32xbf16>, vector<8x32xf32> -> vector<8x32xf32>
    %170 = arith.addf %124, %169 : vector<8x32xf32>
    %c0_119 = arith.constant 0 : index
    %c3 = arith.constant 3 : index
    %c0_120 = arith.constant 0 : index
    %c0_121 = arith.constant 0 : index
    %171 = vector.load %arg7[%c0_119, %c3, %c0_120, %c0_121] : memref<1x12x32x8xbf16, #tpu.memory_space<vmem>>, vector<1x1x32x8xbf16>
    %172 = vector.shape_cast %171 : vector<1x1x32x8xbf16> to vector<32x8xbf16>
    %cst_122 = arith.constant dense<0.000000e+00> : vector<8x8xf32>
    %173 = tpu.matmul %28, %172, %cst_122 {dimension_numbers = #tpu.dot_dimension_numbers<[1], [0], [0], [1], [0, 0, 1, 1], [], []>} : vector<8x32xbf16>, vector<32x8xbf16>, vector<8x8xf32> -> vector<8x8xf32>
    %c0_123 = arith.constant 0 : index
    %c3_124 = arith.constant 3 : index
    %c0_125 = arith.constant 0 : index
    %c0_126 = arith.constant 0 : index
    %174 = vector.load %arg8[%c0_123, %c3_124, %c0_125, %c0_126] : memref<1x12x1x8xf32, #tpu.memory_space<vmem>>, vector<1x1x1x8xf32>
    %175 = vector.shape_cast %174 : vector<1x1x1x8xf32> to vector<1x8xf32>
    %176 = vector.broadcast %175 : vector<1x8xf32> to vector<8x8xf32>
    %177 = arith.addf %173, %176 : vector<8x8xf32>
    %c0_127 = arith.constant 0 : index
    %c7 = arith.constant 7 : index
    %c0_128 = arith.constant 0 : index
    %c0_129 = arith.constant 0 : index
    %178 = vector.load %arg7[%c0_127, %c7, %c0_128, %c0_129] : memref<1x12x32x8xbf16, #tpu.memory_space<vmem>>, vector<1x1x32x8xbf16>
    %179 = vector.shape_cast %178 : vector<1x1x32x8xbf16> to vector<32x8xbf16>
    %cst_130 = arith.constant dense<0.000000e+00> : vector<8x8xf32>
    %180 = tpu.matmul %28, %179, %cst_130 {dimension_numbers = #tpu.dot_dimension_numbers<[1], [0], [0], [1], [0, 0, 1, 1], [], []>} : vector<8x32xbf16>, vector<32x8xbf16>, vector<8x8xf32> -> vector<8x8xf32>
    %c0_131 = arith.constant 0 : index
    %c7_132 = arith.constant 7 : index
    %c0_133 = arith.constant 0 : index
    %c0_134 = arith.constant 0 : index
    %181 = vector.load %arg8[%c0_131, %c7_132, %c0_133, %c0_134] : memref<1x12x1x8xf32, #tpu.memory_space<vmem>>, vector<1x1x1x8xf32>
    %182 = vector.shape_cast %181 : vector<1x1x1x8xf32> to vector<1x8xf32>
    %183 = vector.broadcast %182 : vector<1x8xf32> to vector<8x8xf32>
    %184 = arith.addf %180, %183 : vector<8x8xf32>
    %c0_135 = arith.constant 0 : index
    %c11 = arith.constant 11 : index
    %c0_136 = arith.constant 0 : index
    %c0_137 = arith.constant 0 : index
    %185 = vector.load %arg7[%c0_135, %c11, %c0_136, %c0_137] : memref<1x12x32x8xbf16, #tpu.memory_space<vmem>>, vector<1x1x32x8xbf16>
    %186 = vector.shape_cast %185 : vector<1x1x32x8xbf16> to vector<32x8xbf16>
    %cst_138 = arith.constant dense<0.000000e+00> : vector<8x8xf32>
    %187 = tpu.matmul %28, %186, %cst_138 {dimension_numbers = #tpu.dot_dimension_numbers<[1], [0], [0], [1], [0, 0, 1, 1], [], []>} : vector<8x32xbf16>, vector<32x8xbf16>, vector<8x8xf32> -> vector<8x8xf32>
    %c0_139 = arith.constant 0 : index
    %c11_140 = arith.constant 11 : index
    %c0_141 = arith.constant 0 : index
    %c0_142 = arith.constant 0 : index
    %188 = vector.load %arg8[%c0_139, %c11_140, %c0_141, %c0_142] : memref<1x12x1x8xf32, #tpu.memory_space<vmem>>, vector<1x1x1x8xf32>
    %189 = vector.shape_cast %188 : vector<1x1x1x8xf32> to vector<1x8xf32>
    %190 = vector.broadcast %189 : vector<1x8xf32> to vector<8x8xf32>
    %191 = arith.addf %187, %190 : vector<8x8xf32>
    %192 = arith.truncf %177 : vector<8x8xf32> to vector<8x8xbf16>
    %193 = arith.truncf %184 : vector<8x8xf32> to vector<8x8xbf16>
    %cst_143 = arith.constant dense<0.000000e+00> : vector<8x8xf32>
    %194 = tpu.matmul %192, %193, %cst_143 {dimension_numbers = #tpu.dot_dimension_numbers<[1], [1], [0], [0], [0, 0, 1, 0], [], []>} : vector<8x8xbf16>, vector<8x8xbf16>, vector<8x8xf32> -> vector<8x8xf32>
    %cst_144 = arith.constant 0.353553385 : f32
    %195 = vector.broadcast %cst_144 : f32 to vector<8x8xf32>
    %196 = arith.mulf %194, %195 : vector<8x8xf32>
    %cst_145 = arith.constant -1.000000e+30 : f32
    %197 = vector.broadcast %cst_145 : f32 to vector<8x8xf32>
    %198 = arith.select %31, %196, %197 : vector<8x8xi1>, vector<8x8xf32>
    %cst_146 = arith.constant dense<0xFF800000> : vector<8xf32>
    %199 = vector.multi_reduction <maximumf>, %198, %cst_146 [1] : vector<8x8xf32> to vector<8xf32>
    %200 = vector.shape_cast %199 : vector<8xf32> to vector<8x1xf32>
    %201 = vector.broadcast %200 : vector<8x1xf32> to vector<8x8xf32>
    %202 = arith.subf %198, %201 : vector<8x8xf32>
    %203 = math.exp %202 : vector<8x8xf32>
    %cst_147 = arith.constant dense<0.000000e+00> : vector<8xf32>
    %204 = vector.multi_reduction <add>, %203, %cst_147 [1] : vector<8x8xf32> to vector<8xf32>
    %205 = vector.shape_cast %204 : vector<8xf32> to vector<8x1xf32>
    %206 = tpu.reciprocal %205 : vector<8x1xf32> -> vector<8x1xf32>
    %207 = vector.broadcast %206 : vector<8x1xf32> to vector<8x8xf32>
    %208 = arith.mulf %203, %207 : vector<8x8xf32>
    %209 = arith.truncf %208 : vector<8x8xf32> to vector<8x8xbf16>
    %210 = arith.truncf %191 : vector<8x8xf32> to vector<8x8xbf16>
    %cst_148 = arith.constant dense<0.000000e+00> : vector<8x8xf32>
    %211 = tpu.matmul %209, %210, %cst_148 {dimension_numbers = #tpu.dot_dimension_numbers<[1], [0], [0], [1], [0, 0, 1, 1], [], []>} : vector<8x8xbf16>, vector<8x8xbf16>, vector<8x8xf32> -> vector<8x8xf32>
    %212 = arith.truncf %211 : vector<8x8xf32> to vector<8x8xbf16>
    %c0_149 = arith.constant 0 : index
    %c3_150 = arith.constant 3 : index
    %c0_151 = arith.constant 0 : index
    %c0_152 = arith.constant 0 : index
    %213 = vector.load %arg9[%c0_149, %c3_150, %c0_151, %c0_152] : memref<1x4x8x32xbf16, #tpu.memory_space<vmem>>, vector<1x1x8x32xbf16>
    %214 = vector.shape_cast %213 : vector<1x1x8x32xbf16> to vector<8x32xbf16>
    %cst_153 = arith.constant dense<0.000000e+00> : vector<8x32xf32>
    %215 = tpu.matmul %212, %214, %cst_153 {dimension_numbers = #tpu.dot_dimension_numbers<[1], [0], [0], [1], [0, 0, 1, 1], [], []>} : vector<8x8xbf16>, vector<8x32xbf16>, vector<8x32xf32> -> vector<8x32xf32>
    %216 = arith.addf %170, %215 : vector<8x32xf32>
    %c0_154 = arith.constant 0 : index
    %c0_155 = arith.constant 0 : index
    %c0_156 = arith.constant 0 : index
    %217 = vector.load %arg10[%c0_154, %c0_155, %c0_156] : memref<1x1x32xf32, #tpu.memory_space<vmem>>, vector<1x1x32xf32>
    %218 = vector.shape_cast %217 : vector<1x1x32xf32> to vector<1x32xf32>
    %219 = vector.broadcast %218 : vector<1x32xf32> to vector<8x32xf32>
    %220 = arith.addf %216, %219 : vector<8x32xf32>
    %c0_157 = arith.constant 0 : index
    %c0_158 = arith.constant 0 : index
    %c0_159 = arith.constant 0 : index
    %221 = vector.load %arg11[%c0_157, %c0_158, %c0_159] : memref<1x1x32xf32, #tpu.memory_space<vmem>>, vector<1x1x32xf32>
    %222 = vector.shape_cast %221 : vector<1x1x32xf32> to vector<1x32xf32>
    %223 = vector.broadcast %222 : vector<1x32xf32> to vector<8x32xf32>
    %224 = arith.mulf %220, %223 : vector<8x32xf32>
    %225 = arith.addf %3, %224 : vector<8x32xf32>
    %c0_160 = arith.constant 0 : index
    %c0_161 = arith.constant 0 : index
    %c0_162 = arith.constant 0 : index
    %226 = vector.load %arg12[%c0_160, %c0_161, %c0_162] : memref<1x1x32xf32, #tpu.memory_space<vmem>>, vector<1x1x32xf32>
    %227 = vector.shape_cast %226 : vector<1x1x32xf32> to vector<1x32xf32>
    %c0_163 = arith.constant 0 : index
    %c0_164 = arith.constant 0 : index
    %c0_165 = arith.constant 0 : index
    %228 = vector.load %arg13[%c0_163, %c0_164, %c0_165] : memref<1x1x32xf32, #tpu.memory_space<vmem>>, vector<1x1x32xf32>
    %229 = vector.shape_cast %228 : vector<1x1x32xf32> to vector<1x32xf32>
    %cst_166 = arith.constant dense<0.000000e+00> : vector<8xf32>
    %230 = vector.multi_reduction <add>, %225, %cst_166 [1] : vector<8x32xf32> to vector<8xf32>
    %231 = vector.shape_cast %230 : vector<8xf32> to vector<8x1xf32>
    %cst_167 = arith.constant 3.200000e+01 : f32
    %232 = vector.broadcast %cst_167 : f32 to vector<8x1xf32>
    %233 = arith.divf %231, %232 : vector<8x1xf32>
    %234 = vector.broadcast %233 : vector<8x1xf32> to vector<8x32xf32>
    %235 = arith.subf %225, %234 : vector<8x32xf32>
    %236 = arith.mulf %235, %235 : vector<8x32xf32>
    %cst_168 = arith.constant dense<0.000000e+00> : vector<8xf32>
    %237 = vector.multi_reduction <add>, %236, %cst_168 [1] : vector<8x32xf32> to vector<8xf32>
    %238 = vector.shape_cast %237 : vector<8xf32> to vector<8x1xf32>
    %cst_169 = arith.constant 3.200000e+01 : f32
    %239 = vector.broadcast %cst_169 : f32 to vector<8x1xf32>
    %240 = arith.divf %238, %239 : vector<8x1xf32>
    %cst_170 = arith.constant 9.99999997E-7 : f32
    %241 = vector.broadcast %cst_170 : f32 to vector<8x1xf32>
    %242 = arith.addf %240, %241 : vector<8x1xf32>
    %243 = math.rsqrt %242 : vector<8x1xf32>
    %244 = vector.broadcast %243 : vector<8x1xf32> to vector<8x32xf32>
    %245 = arith.mulf %235, %244 : vector<8x32xf32>
    %246 = vector.broadcast %227 : vector<1x32xf32> to vector<8x32xf32>
    %247 = arith.mulf %245, %246 : vector<8x32xf32>
    %248 = vector.broadcast %229 : vector<1x32xf32> to vector<8x32xf32>
    %249 = arith.addf %247, %248 : vector<8x32xf32>
    %250 = arith.truncf %249 : vector<8x32xf32> to vector<8x32xbf16>
    %c0_171 = arith.constant 0 : index
    %c0_172 = arith.constant 0 : index
    %c0_173 = arith.constant 0 : index
    %251 = vector.load %arg14[%c0_171, %c0_172, %c0_173] : memref<1x32x128xbf16, #tpu.memory_space<vmem>>, vector<1x32x128xbf16>
    %252 = vector.shape_cast %251 : vector<1x32x128xbf16> to vector<32x128xbf16>
    %cst_174 = arith.constant dense<0.000000e+00> : vector<8x128xf32>
    %253 = tpu.matmul %250, %252, %cst_174 {dimension_numbers = #tpu.dot_dimension_numbers<[1], [0], [0], [1], [0, 0, 1, 1], [], []>} : vector<8x32xbf16>, vector<32x128xbf16>, vector<8x128xf32> -> vector<8x128xf32>
    %c0_175 = arith.constant 0 : index
    %c0_176 = arith.constant 0 : index
    %c0_177 = arith.constant 0 : index
    %254 = vector.load %arg15[%c0_175, %c0_176, %c0_177] : memref<1x1x128xf32, #tpu.memory_space<vmem>>, vector<1x1x128xf32>
    %255 = vector.shape_cast %254 : vector<1x1x128xf32> to vector<1x128xf32>
    %256 = vector.broadcast %255 : vector<1x128xf32> to vector<8x128xf32>
    %257 = arith.addf %253, %256 : vector<8x128xf32>
    %258 = arith.mulf %257, %257 : vector<8x128xf32>
    %259 = arith.mulf %257, %258 : vector<8x128xf32>
    %cst_178 = arith.constant 4.471500e-02 : f32
    %260 = vector.broadcast %cst_178 : f32 to vector<8x128xf32>
    %261 = arith.mulf %260, %259 : vector<8x128xf32>
    %262 = arith.addf %257, %261 : vector<8x128xf32>
    %cst_179 = arith.constant 0.797884583 : f32
    %263 = vector.broadcast %cst_179 : f32 to vector<8x128xf32>
    %264 = arith.mulf %263, %262 : vector<8x128xf32>
    %265 = math.tanh %264 : vector<8x128xf32>
    %cst_180 = arith.constant 1.000000e+00 : f32
    %266 = vector.broadcast %cst_180 : f32 to vector<8x128xf32>
    %267 = arith.addf %266, %265 : vector<8x128xf32>
    %cst_181 = arith.constant 5.000000e-01 : f32
    %268 = vector.broadcast %cst_181 : f32 to vector<8x128xf32>
    %269 = arith.mulf %268, %267 : vector<8x128xf32>
    %270 = arith.mulf %257, %269 : vector<8x128xf32>
    %271 = arith.truncf %270 : vector<8x128xf32> to vector<8x128xbf16>
    %c0_182 = arith.constant 0 : index
    %c0_183 = arith.constant 0 : index
    %c0_184 = arith.constant 0 : index
    %272 = vector.load %arg16[%c0_182, %c0_183, %c0_184] : memref<1x128x32xbf16, #tpu.memory_space<vmem>>, vector<1x128x32xbf16>
    %273 = vector.shape_cast %272 : vector<1x128x32xbf16> to vector<128x32xbf16>
    %cst_185 = arith.constant dense<0.000000e+00> : vector<8x32xf32>
    %274 = tpu.matmul %271, %273, %cst_185 {dimension_numbers = #tpu.dot_dimension_numbers<[1], [0], [0], [1], [0, 0, 1, 1], [], []>} : vector<8x128xbf16>, vector<128x32xbf16>, vector<8x32xf32> -> vector<8x32xf32>
    %c0_186 = arith.constant 0 : index
    %c0_187 = arith.constant 0 : index
    %c0_188 = arith.constant 0 : index
    %275 = vector.load %arg17[%c0_186, %c0_187, %c0_188] : memref<1x1x32xf32, #tpu.memory_space<vmem>>, vector<1x1x32xf32>
    %276 = vector.shape_cast %275 : vector<1x1x32xf32> to vector<1x32xf32>
    %277 = vector.broadcast %276 : vector<1x32xf32> to vector<8x32xf32>
    %278 = arith.addf %274, %277 : vector<8x32xf32>
    %c0_189 = arith.constant 0 : index
    %c0_190 = arith.constant 0 : index
    %c0_191 = arith.constant 0 : index
    %279 = vector.load %arg18[%c0_189, %c0_190, %c0_191] : memref<1x1x32xf32, #tpu.memory_space<vmem>>, vector<1x1x32xf32>
    %280 = vector.shape_cast %279 : vector<1x1x32xf32> to vector<1x32xf32>
    %281 = vector.broadcast %280 : vector<1x32xf32> to vector<8x32xf32>
    %282 = arith.mulf %278, %281 : vector<8x32xf32>
    %283 = arith.addf %225, %282 : vector<8x32xf32>
    %c0_192 = arith.constant 0 : index
    %c0_193 = arith.constant 0 : index
    %284 = vector.load %arg22[%c0_192, %c0_193] : memref<8x32xf32, #tpu.memory_space<vmem>>, vector<8x32xf32>
    tpu.vector_store %arg22[%c0_192, %c0_193], %283 {strides = array<i32>} : memref<8x32xf32, #tpu.memory_space<vmem>>, vector<8x32xf32>,
    %c1_i32 = arith.constant 1 : i32
    %285 = arith.cmpi eq, %arg1, %c1_i32 : i32
    %286 = arith.extui %285 : i1 to i32
    %c0_i32_194 = arith.constant 0 : i32
    %287 = arith.cmpi ne, %286, %c0_i32_194 : i32
    scf.if %287 {
      %c0_195 = arith.constant 0 : index
      %c0_196 = arith.constant 0 : index
      %288 = vector.load %arg19[%c0_195, %c0_196] : memref<1x32xf32, #tpu.memory_space<vmem>>, vector<1x32xf32>
      %c0_197 = arith.constant 0 : index
      %c0_198 = arith.constant 0 : index
      %289 = vector.load %arg20[%c0_197, %c0_198] : memref<1x32xf32, #tpu.memory_space<vmem>>, vector<1x32xf32>
      %cst_199 = arith.constant dense<0.000000e+00> : vector<8xf32>
      %290 = vector.multi_reduction <add>, %283, %cst_199 [1] : vector<8x32xf32> to vector<8xf32>
      %291 = vector.shape_cast %290 : vector<8xf32> to vector<8x1xf32>
      %cst_200 = arith.constant 3.200000e+01 : f32
      %292 = vector.broadcast %cst_200 : f32 to vector<8x1xf32>
      %293 = arith.divf %291, %292 : vector<8x1xf32>
      %294 = vector.broadcast %293 : vector<8x1xf32> to vector<8x32xf32>
      %295 = arith.subf %283, %294 : vector<8x32xf32>
      %296 = arith.mulf %295, %295 : vector<8x32xf32>
      %cst_201 = arith.constant dense<0.000000e+00> : vector<8xf32>
      %297 = vector.multi_reduction <add>, %296, %cst_201 [1] : vector<8x32xf32> to vector<8xf32>
      %298 = vector.shape_cast %297 : vector<8xf32> to vector<8x1xf32>
      %cst_202 = arith.constant 3.200000e+01 : f32
      %299 = vector.broadcast %cst_202 : f32 to vector<8x1xf32>
      %300 = arith.divf %298, %299 : vector<8x1xf32>
      %cst_203 = arith.constant 9.99999997E-7 : f32
      %301 = vector.broadcast %cst_203 : f32 to vector<8x1xf32>
      %302 = arith.addf %300, %301 : vector<8x1xf32>
      %303 = math.rsqrt %302 : vector<8x1xf32>
      %304 = vector.broadcast %303 : vector<8x1xf32> to vector<8x32xf32>
      %305 = arith.mulf %295, %304 : vector<8x32xf32>
      %306 = vector.broadcast %288 : vector<1x32xf32> to vector<8x32xf32>
      %307 = arith.mulf %305, %306 : vector<8x32xf32>
      %308 = vector.broadcast %289 : vector<1x32xf32> to vector<8x32xf32>
      %309 = arith.addf %307, %308 : vector<8x32xf32>
      %310 = vector.extract_strided_slice %309 {offsets = [0, 0], sizes = [4, 32], strides = [1, 1]} : vector<8x32xf32> to vector<4x32xf32>
      %c0_204 = arith.constant 0 : index
      %c0_205 = arith.constant 0 : index
      %c0_206 = arith.constant 0 : index
      %311 = vector.load %arg21[%c0_204, %c0_205, %c0_206] : memref<1x4x32xf32, #tpu.memory_space<vmem>>, vector<1x4x32xf32>
      %312 = vector.shape_cast %311 : vector<1x4x32xf32> to vector<4x32xf32>
      %313 = vector.shape_cast %310 : vector<4x32xf32> to vector<1x4x32xf32>
      tpu.vector_store %arg21[%c0_204, %c0_205, %c0_206], %313 {strides = array<i32>} : memref<1x4x32xf32, #tpu.memory_space<vmem>>, vector<1x4x32xf32>,
    } else {
    }
    return
  }
  func.func @transform_0(%arg0: i32, %arg1: i32) -> (i32, i32, i32) {
    %c0_i32 = arith.constant 0 : i32
    %c0_i32_0 = arith.constant 0 : i32
    %c0_i32_1 = arith.constant 0 : i32
    return %arg0, %c0_i32, %c0_i32_0 : i32, i32, i32
  }
  func.func @transform_1(%arg0: i32, %arg1: i32) -> (i32, i32) {
    %c0_i32 = arith.constant 0 : i32
    %c0_i32_0 = arith.constant 0 : i32
    %c0_i32_1 = arith.constant 0 : i32
    return %c0_i32, %c0_i32_0 : i32, i32
  }
  func.func @transform_2(%arg0: i32, %arg1: i32) -> (i32, i32) {
    %c0_i32 = arith.constant 0 : i32
    %c0_i32_0 = arith.constant 0 : i32
    %c0_i32_1 = arith.constant 0 : i32
    return %c0_i32, %c0_i32_0 : i32, i32
  }
  func.func @transform_3(%arg0: i32, %arg1: i32) -> (i32, i32, i32) {
    %c0_i32 = arith.constant 0 : i32
    %c0_i32_0 = arith.constant 0 : i32
    %c0_i32_1 = arith.constant 0 : i32
    return %arg1, %c0_i32, %c0_i32_0 : i32, i32, i32
  }
  func.func @transform_4(%arg0: i32, %arg1: i32) -> (i32, i32, i32) {
    %c0_i32 = arith.constant 0 : i32
    %c0_i32_0 = arith.constant 0 : i32
    %c0_i32_1 = arith.constant 0 : i32
    return %arg1, %c0_i32, %c0_i32_0 : i32, i32, i32
  }
  func.func @transform_5(%arg0: i32, %arg1: i32) -> (i32, i32, i32, i32) {
    %c0_i32 = arith.constant 0 : i32
    %c0_i32_0 = arith.constant 0 : i32
    %c0_i32_1 = arith.constant 0 : i32
    %c0_i32_2 = arith.constant 0 : i32
    return %arg1, %c0_i32, %c0_i32_0, %c0_i32_1 : i32, i32, i32, i32
  }
  func.func @transform_6(%arg0: i32, %arg1: i32) -> (i32, i32, i32, i32) {
    %c0_i32 = arith.constant 0 : i32
    %c0_i32_0 = arith.constant 0 : i32
    %c0_i32_1 = arith.constant 0 : i32
    %c0_i32_2 = arith.constant 0 : i32
    return %arg1, %c0_i32, %c0_i32_0, %c0_i32_1 : i32, i32, i32, i32
  }
  func.func @transform_7(%arg0: i32, %arg1: i32) -> (i32, i32, i32, i32) {
    %c0_i32 = arith.constant 0 : i32
    %c0_i32_0 = arith.constant 0 : i32
    %c0_i32_1 = arith.constant 0 : i32
    %c0_i32_2 = arith.constant 0 : i32
    return %arg1, %c0_i32, %c0_i32_0, %c0_i32_1 : i32, i32, i32, i32
  }
  func.func @transform_8(%arg0: i32, %arg1: i32) -> (i32, i32, i32) {
    %c0_i32 = arith.constant 0 : i32
    %c0_i32_0 = arith.constant 0 : i32
    %c0_i32_1 = arith.constant 0 : i32
    return %arg1, %c0_i32, %c0_i32_0 : i32, i32, i32
  }
  func.func @transform_9(%arg0: i32, %arg1: i32) -> (i32, i32, i32) {
    %c0_i32 = arith.constant 0 : i32
    %c0_i32_0 = arith.constant 0 : i32
    %c0_i32_1 = arith.constant 0 : i32
    return %arg1, %c0_i32, %c0_i32_0 : i32, i32, i32
  }
  func.func @transform_10(%arg0: i32, %arg1: i32) -> (i32, i32, i32) {
    %c0_i32 = arith.constant 0 : i32
    %c0_i32_0 = arith.constant 0 : i32
    %c0_i32_1 = arith.constant 0 : i32
    return %arg1, %c0_i32, %c0_i32_0 : i32, i32, i32
  }
  func.func @transform_11(%arg0: i32, %arg1: i32) -> (i32, i32, i32) {
    %c0_i32 = arith.constant 0 : i32
    %c0_i32_0 = arith.constant 0 : i32
    %c0_i32_1 = arith.constant 0 : i32
    return %arg1, %c0_i32, %c0_i32_0 : i32, i32, i32
  }
  func.func @transform_12(%arg0: i32, %arg1: i32) -> (i32, i32, i32) {
    %c0_i32 = arith.constant 0 : i32
    %c0_i32_0 = arith.constant 0 : i32
    %c0_i32_1 = arith.constant 0 : i32
    return %arg1, %c0_i32, %c0_i32_0 : i32, i32, i32
  }
  func.func @transform_13(%arg0: i32, %arg1: i32) -> (i32, i32, i32) {
    %c0_i32 = arith.constant 0 : i32
    %c0_i32_0 = arith.constant 0 : i32
    %c0_i32_1 = arith.constant 0 : i32
    return %arg1, %c0_i32, %c0_i32_0 : i32, i32, i32
  }
  func.func @transform_14(%arg0: i32, %arg1: i32) -> (i32, i32, i32) {
    %c0_i32 = arith.constant 0 : i32
    %c0_i32_0 = arith.constant 0 : i32
    %c0_i32_1 = arith.constant 0 : i32
    return %arg1, %c0_i32, %c0_i32_0 : i32, i32, i32
  }
  func.func @transform_15(%arg0: i32, %arg1: i32) -> (i32, i32, i32) {
    %c0_i32 = arith.constant 0 : i32
    %c0_i32_0 = arith.constant 0 : i32
    %c0_i32_1 = arith.constant 0 : i32
    return %arg1, %c0_i32, %c0_i32_0 : i32, i32, i32
  }
  func.func @transform_16(%arg0: i32, %arg1: i32) -> (i32, i32, i32) {
    %c0_i32 = arith.constant 0 : i32
    %c0_i32_0 = arith.constant 0 : i32
    %c0_i32_1 = arith.constant 0 : i32
    return %arg1, %c0_i32, %c0_i32_0 : i32, i32, i32
  }
  func.func @transform_17(%arg0: i32, %arg1: i32) -> (i32, i32) {
    %c0_i32 = arith.constant 0 : i32
    %c0_i32_0 = arith.constant 0 : i32
    %c0_i32_1 = arith.constant 0 : i32
    return %c0_i32, %c0_i32_0 : i32, i32
  }
  func.func @transform_18(%arg0: i32, %arg1: i32) -> (i32, i32) {
    %c0_i32 = arith.constant 0 : i32
    %c0_i32_0 = arith.constant 0 : i32
    %c0_i32_1 = arith.constant 0 : i32
    return %c0_i32, %c0_i32_0 : i32, i32
  }
  func.func @transform_19(%arg0: i32, %arg1: i32) -> (i32, i32, i32) {
    %c0_i32 = arith.constant 0 : i32
    %c0_i32_0 = arith.constant 0 : i32
    %c0_i32_1 = arith.constant 0 : i32
    return %arg0, %c0_i32, %c0_i32_0 : i32, i32, i32
  }
}

</mosaic_0001>

<bundles_post_ra>
// kernel: tpu_custom_call.1
= control target key start
LH: loop header
LB: loop body
LE: loop exit
PB: predicated region body
PF: predicated region fallthrough
CT: control target
= control target key end

     0   :  { %s4282_s0 = inlined_call_operand.vmem [shape: bf16[2,8,192], index: 0, kind: input, shape index: {}]   ;;  %s4283_s1 = inlined_call_operand.vmem [shape: f32[8,32], index: 1, kind: input, shape index: {}]   ;;  %s4284_s2 = inlined_call_operand.vmem [shape: bf16[192,32], index: 2, kind: input, shape index: {}]   ;;  %s4285_s3 = inlined_call_operand.vmem [shape: f32[2,1,32], index: 3, kind: input, shape index: {}]   ;;  %s4286_s4 = inlined_call_operand.vmem [shape: f32[2,1,32], index: 4, kind: input, shape index: {}]   ;;  %s4287_s5 = inlined_call_operand.vmem [shape: bf16[2,12,32,8], index: 5, kind: input, shape index: {}]   ;;  %s4288_s6 = inlined_call_operand.vmem [shape: f32[2,12,1,8], index: 6, kind: input, shape index: {}]   ;;  %s4289_s7 = inlined_call_operand.vmem [shape: bf16[2,4,8,32], index: 7, kind: input, shape index: {}]   ;;  %s4290_s8 = inlined_call_operand.vmem [shape: f32[2,1,32], index: 8, kind: input, shape index: {}]   ;;  %s4291_s9 = inlined_call_operand.vmem [shape: f32[2,1,32], index: 9, kind: input, shape index: {}]   ;;  %s4292_s10 = inlined_call_operand.vmem [shape: f32[2,1,32], index: 10, kind: input, shape index: {}]   ;;  %s4293_s11 = inlined_call_operand.vmem [shape: f32[2,1,32], index: 11, kind: input, shape index: {}]   ;;  %s4294_s12 = inlined_call_operand.vmem [shape: bf16[2,32,128], index: 12, kind: input, shape index: {}]   ;;  %s4295_s13 = inlined_call_operand.vmem [shape: f32[2,1,128], index: 13, kind: input, shape index: {}]   ;;  %s4296_s14 = inlined_call_operand.vmem [shape: bf16[2,128,32], index: 14, kind: input, shape index: {}]   ;;  %s4297_s15 = inlined_call_operand.vmem [shape: f32[2,1,32], index: 15, kind: input, shape index: {}]   ;;  %s4298_s16 = inlined_call_operand.vmem [shape: f32[2,1,32], index: 16, kind: input, shape index: {}]   ;;  %s4299_s17 = inlined_call_operand.vmem [shape: f32[1,32], index: 17, kind: input, shape index: {}]   ;;  %s4300_s18 = inlined_call_operand.vmem [shape: f32[1,32], index: 18, kind: input, shape index: {}]   ;;  %s4301_s19 = inlined_call_operand.hbm [shape: f32[2,4,32], index: 19, kind: output, shape index: {}]  }
   0x1   :  { %4319 = sst [smem:[#allocation20_spill]] %s4282_s0 }
   0x2   :  { %4320 = sst [smem:[#allocation21_spill]] %s4283_s1 }
   0x3   :  { %4321 = sst [smem:[#allocation22_spill]] %s4284_s2 }
   0x4   :  { %4322 = sst [smem:[#allocation23_spill]] %s4285_s3 }
   0x5   :  { %4323 = sst [smem:[#allocation24_spill]] %s4286_s4 }
   0x6   :  { %4324 = sst [smem:[#allocation25_spill]] %s4287_s5 }
   0x7   :  { %4325 = sst [smem:[#allocation26_spill]] %s4289_s7 }
   0x8   :  { %4326 = sst [smem:[#allocation27_spill]] %s4298_s16 }
   0x9   :  { %4327 = sst [smem:[#allocation28_spill]] %s4299_s17 }
   0xa   :  { %4328 = sst [smem:[#allocation29_spill]] %s4300_s18 }
   0xb   :  { %4329 = sst [smem:[#allocation30_spill]] %s4301_s19 }
   0xc   :  { %24 = vsyncpa [#allocation4], 0 }
   0xd   :  { %26 = vsyncpa [#allocation4 + $0x1], 0  ;;  %s3743_s0 = smov 0   ;;  %s3745_s30 = smov 0  }
   0xe   :  { %s3747_s20 = smov 0   ;;  %s3749_s21 = smov 0  }
   0xf   :  { %s3751_s1 = smov 0   ;;  %s3753_s22 = smov 0  }
  0x10   :  { %s3755_s2 = smov 0   ;;  %s3757_s23 = smov 0  }
  0x11 LB: > { %4330 = sst [smem:[#allocation6_spill]] %s3609_s0  ;;  %s2947_s24 = sadd.s32 4294967295, %s3637_s23   ;;  %s3637_s23 = sphi %s3757_s23, %s32_s23   ;;  %s3633_s2 = sphi %s3755_s2, %s4383_s2   ;;  %s3629_s22 = sphi %s3753_s22, %s4382_s22   ;;  %s3625_s1 = sphi %s3751_s1, %s4381_s1   ;;  %s3621_s21 = sphi %s3749_s21, %s4380_s21   ;;  %s3617_s20 = sphi %s3747_s20, %s4379_s20   ;;  %s3613_s30 = sphi %s3745_s30, %s4378_s30   ;;  %s3609_s0 = sphi %s3743_s0, %s4377_s0  }
  0x12   : > { %4331 = sst [smem:[#allocation7_spill]] %s3613_s30  ;;  %s2948_s25 = sadd.s32 4294967294, %s3637_s23  }
  0x13   : > { %4332 = sst [smem:[#allocation8_spill]] %s3617_s20  ;;  %s41_s3 = sadd.s32 1, %s3629_s22 }
  0x14   : > { %4333 = sst [smem:[#allocation9_spill]] %s3621_s21  ;;  %p42_p0 = scmp.ge.s32.totalorder %s41_s3, 2 }
  0x15   : > { %4334 = sst [smem:[#allocation10_spill]] %s3625_s1  ;;  %s44_s26 = sadd.s32 1, %s3633_s2 }
  0x16   : > { %4335 = sst [smem:[#allocation11_spill]] %s3629_s22  ;;  %p535_p1 = scmp.ne.s32.totalorder %s3617_s20, %s3613_s30 }
  0x17   : > { %4336 = sst [smem:[#allocation12_spill]] %s3633_s2  ;;  %p536_p2 = scmp.eq.s32.totalorder %s2947_s24, 3 }
  0x18   : > { %4337 = sst [smem:[#allocation13_spill]] %s3637_s23  ;;  %s4385_s3 = smov (%p42_p0, %s41_s3), 0 }
  0x19   : > { %4338 = sst [smem:[#allocation14_spill]] %s4385_s3  ;;  %s4387_s26 = smov (!%p42_p0, %s44_s26), %s3633_s2 }
  0x1a   : > { %p3792_p3 = por %p536_p2, %p535_p1  ;;  %p541_p4 = scmp.ne.s32.totalorder %s3613_s30, %s3609_s0 }
  0x1b   : > { %p46_p5 = scmp.ge.s32.totalorder %s4387_s26, 2  ;;  %p542_p6 = scmp.eq.s32.totalorder %s2948_s25, 3 }
  0x1c   : > { %s4339_s27 = scalar_select %p3792_p3, 1, 0 }
  0x1d   : > { %p2951_p7 = scmp.ge.s32.totalorder %s3637_s23, 1  ;;  %p673_p8 = scmp.lt.s32.totalorder %s3637_s23, 5 }
  0x1e   : > { %4340 = sst [smem:[#allocation15_spill]] %s4339_s27  ;;  %s4389_s26 = smov (%p46_p5, %s4387_s26), 0 }
  0x1f   : > { %4341 = sst [smem:[#allocation16_spill]] %s4389_s26  ;;  %p3802_p9 = por %p542_p6, %p541_p4 }
  0x20   : > { %p674_p10 = pnand %p2951_p7, %p673_p8  ;;  %s522_s29 = ssub.s32 %s3633_s2, %s4389_s26 }
  0x21   : > { %s4342_s28 = scalar_select %p3802_p9, 1, 0 }
  0x22   : > { %s525_s24 = sadd.s32 1, %s3617_s20  ;;  %p523_p11 = scmp.eq.s32.totalorder %s522_s29, 0 }
  0x23   : > { %4343 = sst [smem:[#allocation17_spill]] %s4342_s28  ;;  %677 = sbr.rel (%p674_p10) target bundleno = 5670 (0x1626), region = 96 }
  0x24   : > { %s3810_s3 = scalar_select %p523_p11, %s3617_s20, %s525_s24  }
  0x26   : > { %4344 = sst [smem:[#allocation18_spill]] %s3810_s3 }
  0x2a   : > { %s4308_s25 = sand.u32 1, %s3613_s30   ;;  %p780_p12 = scmp.lt.s32.totalorder %s3625_s1, 1 }
  0x2b   : > { %s3816_s22 = sshll.u32 %s4308_s25, 2  ;;  %p785_p13 = scmp.lt.s32.totalorder %s3621_s21, 1 }
  0x2c   : > { %s781_s28 = scalar_select %p780_p12, %s3625_s1, 1 }
  0x2d   : > { %s3821_s0 = scalar_select %p785_p13, %s3621_s21, 1 }
  0x2e   : > { %s3123_s29 = sshll.u32 %s781_s28, 3  ;;  %s4345_s2 = sld [smem:[#allocation20_spill]] }
  0x2f   : > { %s3395_s18 = smul.u32 192, %s3821_s0  ;;  %s3124_s28 = sshll.u32 %s3821_s0, 4 }
  0x30   : > { %s3396_s17 = smul.u32 12, %s3821_s0  ;;  %s4348_s5 = sld [smem:[#allocation25_spill]] }
  0x31   : > { %s4349_s7 = sld [smem:[#allocation26_spill]]  ;;  %s3126_s1 = sshll.u32 %s3821_s0, 6 }
  0x32   : > { %s3852_s30 = scalar_lea.vmem %s4288_s6, %s3396_s17  ;;  %s3873_s17 = scalar_lea.vmem %s4294_s12, %s3124_s28 }
  0x33   : > { %s3883_s16 = scalar_lea.vmem %s4296_s14, %s3126_s1  ;;  %s4352_s23 = sld [smem:[#allocation9_spill]] }
  0x34   : > { %s3826_s25 = scalar_lea.vmem %s4345_s2, %s3123_s29  ;;  %s832_s2 = scalar_lea.vmem %s4297_s15, %s3821_s0 }
  0x36   : > { %s3842_s26 = scalar_lea.vmem %s4348_s5, %s3395_s18  ;;  %s4351_s5 = sld [smem:[#allocation27_spill]] }
  0x37   : > { %s3847_s20 = scalar_lea.vmem %s4349_s7, %s3124_s28  ;;  %s779_s28 = scalar_lea.vmem [#allocation3], %s3816_s22 }
  0x38   : > { %4350 = sst [smem:[#allocation19_spill]] %s3847_s20 }
  0x39   : > { %p2962_p0 = scmp.ne.s32.totalorder %s4352_s23, 0 }
  0x3a   : > { %s4353_s24 = sld [smem:[#allocation22_spill]] (!%p2962_p0)  ;;  %v3639_v1 = vmov (!%p2962_p0), 0   ;;  %v841_v5 = vld [vmem:[%s3826_s25] sm:$0xff] (!%p2962_p0)  ;;  %vm945_vm0 = vcmask (!%p2962_p0), 523264   ;;  %s4354_s25 = sld [smem:[#allocation21_spill]] (!%p2962_p0)  ;;  %vm989_vm1 = vcmask (!%p2962_p0), 261120  }
  0x3b   : > { %840 = sbr.rel (%p2962_p0) target bundleno = 327 (0x147), region = 100  ;;  %949 = vmatprep.subr.bf16.mxu0 (!%p2962_p0), %v3639_v1  ;;  %v2964_v6 = vcombine.high (!%p2962_p0), %v841_v5, %v841_v5  ;;  %v2963_v15 = vcombine.low (!%p2962_p0), %v841_v5, %v841_v5 }
  0x3c   : > { %s835_s20 = scalar_lea.vmem %s4351_s5, %s3821_s0 }
  0x3d   : > { %2977 = vmatprep.mubr.msk.bf16.mxu0 (!%p2962_p0), %vm945_vm0, %v2964_v6 }
  0x40   : > { %v3471_v0 = vld [vmem:[%s4353_s24] sm:$0xff] (!%p2962_p0)   ;;  %v3472_v2 = vld [vmem:[%s4353_s24 + $0x8] sm:$0xff] (!%p2962_p0)   ;;  %v3473_v3 = vld [vmem:[%s4353_s24 + $0x10] sm:$0xff] (!%p2962_p0)  }
  0x41   : > { %950 = vmatpush1.bf16.msra.mxu0 (!%p2962_p0), %v3471_v0  ;;  %v3474_v4 = vld [vmem:[%s4353_s24 + $0x18] sm:$0xff] (!%p2962_p0)   ;;  %v3475_v7 = vld [vmem:[%s4353_s24 + $0x20] sm:$0xff] (!%p2962_p0)   ;;  %v3476_v8 = vld [vmem:[%s4353_s24 + $0x28] sm:$0xff] (!%p2962_p0)  }
  0x42   : > { %951 = vmatprep.subr.bf16.mxu0 %v3639_v1  ;;  %v3477_v9 = vld [vmem:[%s4353_s24 + $0x30] sm:$0xff]   ;;  %v3478_v10 = vld [vmem:[%s4353_s24 + $0x38] sm:$0xff]   ;;  %v3479_v11 = vld [vmem:[%s4353_s24 + $0x40] sm:$0xff]  }
  0x43   : > { %v3480_v12 = vld [vmem:[%s4353_s24 + $0x48] sm:$0xff]   ;;  %v3481_v13 = vld [vmem:[%s4353_s24 + $0x50] sm:$0xff]   ;;  %v3482_v14 = vld [vmem:[%s4353_s24 + $0x58] sm:$0xff]  }
  0x44   : > { %v866_v16 = vld [vmem:[%s4354_s25] sm:$0xff] }
  0x45   : > { %952 = vmatpush1.bf16.msra.mxu0 %v3472_v2 }
  0x46   : > { %953 = vmatprep.subr.bf16.mxu0 %v3639_v1 }
  0x49   : > { %954 = vmatpush1.bf16.msra.mxu0 %v3473_v3 }
  0x4a   : > { %955 = vmatprep.subr.bf16.mxu0 %v3639_v1 }
  0x4d   : > { %956 = vmatpush1.bf16.msra.mxu0 %v3474_v4 }
  0x4e   : > { %957 = vmatprep.subr.bf16.mxu0 %v3639_v1 }
  0x51   : > { %958 = vmatpush1.bf16.msra.mxu0 %v3475_v7 }
  0x52   : > { %959 = vmatprep.subr.bf16.mxu0 %v3639_v1 }
  0x55   : > { %960 = vmatpush1.bf16.msra.mxu0 %v3476_v8 }
  0x56   : > { %961 = vmatprep.subr.bf16.mxu0 %v3639_v1 }
  0x59   : > { %962 = vmatpush1.bf16.msra.mxu0 %v3477_v9 }
  0x5a   : > { %963 = vmatprep.subr.bf16.mxu0 %v3639_v1 }
  0x5d   : > { %964 = vmatpush1.bf16.msra.mxu0 %v3478_v10 }
  0x5e   : > { %965 = vmatprep.subr.bf16.mxu0 %v3639_v1 }
  0x61   : > { %966 = vmatpush1.bf16.msra.mxu0 %v3479_v11 }
  0x62   : > { %967 = vmatprep.subr.bf16.mxu0 %v3639_v1 }
  0x65   : > { %968 = vmatpush1.bf16.msra.mxu0 %v3480_v12 }
  0x66   : > { %969 = vmatprep.subr.bf16.mxu0 %v3639_v1 }
  0x69   : > { %970 = vmatpush1.bf16.msra.mxu0 %v3481_v13 }
  0x6a   : > { %971 = vmatprep.subr.bf16.mxu0 %v3639_v1 }
  0x6d   : > { %972 = vmatpush1.bf16.msra.mxu0 %v3482_v14 }
  0x70   : > { %982 = vmatmul.mubr.bf16.vlgmr.msra.gmra.mrb[0].mxu0 %v2963_v15 }
 0x143   : > { %v983_v17 = vpop.f32.mrb[0].mxu0 }
 0x144   : > { %v984_v18 = vadd.f32 %v983_v17, %v866_v16  ;;  %v985_v19 = vpop.f32.mrb[1].mxu0 }
 0x145   : > { %v986_v20 = vpop.f32.mrb[2].mxu0 }
 0x146   : > { %990 = vst.msk [vmem:[#allocation2] sm:$0xff] %vm989_vm1, %v984_v18  ;;  %v987_v21 = vpop.f32.mrb[3].mxu0 }
 0x147 PF: > { %vm994_vm2 = vcmask 261120   ;;  %v3485_v29 = vld [vmem:[%s3842_s26] sm:$0xff]   ;;  %v3640_v30 = vmov 0.0   ;;  %v3486_v31 = vld [vmem:[%s3842_s26 + $0x8] sm:$0xff]   ;;  %vm3641_vm3 = vmmov 0   ;;  %s4355_s5 = sld [smem:[#allocation23_spill]]  ;;  %v1024_v9 = vlaneseq  ;;  %s4360_s27 = scalar_lea.vmem %s4290_s8, %s3821_s0 }
 0x148   : > { %3199 = vmatprep.subr.bf16.mxu0 %v3640_v30  ;;  %3223 = vmatprep.subr.bf16.mxu1 %v3640_v30  ;;  %s4357_s29 = sld [smem:[#allocation24_spill]]  ;;  %v3487_v41 = vld [vmem:[%s3842_s26 + $0x40] sm:$0xff]   ;;  %v3488_v43 = vld [vmem:[%s3842_s26 + $0x48] sm:$0xff]   ;;  %vm1225_vm4 = vcmask 64512   ;;  %vm1290_vm5 = vcmask 1043456   ;;  %v3491_v1 = vld [vmem:[%s3842_s26 + $0x10] sm:$0xff]   ;;  %s4361_s4 = scalar_lea.vmem %s4291_s9, %s3821_s0 }
 0x149   : > { %3200 = vmatpush3.bf16.msra.mxu0 %v3485_v29  ;;  %3203 = vmatprep.mubr.msk.bf16.mxu0 %vm3641_vm3, %v3640_v30  ;;  %v3489_v44 = vld [vmem:[%s3842_s26 + $0x80] sm:$0xff]   ;;  %v3490_v45 = vld [vmem:[%s3842_s26 + $0x88] sm:$0xff]   ;;  %v3492_v6 = vld [vmem:[%s3842_s26 + $0x18] sm:$0xff]   ;;  %v4009_v10 = vand.u32 127, %v1024_v9  ;;  %s4359_s3 = sld [smem:[#allocation19_spill]]  ;;  %s4366_s25 = sld [smem:[#allocation9_spill]] }
 0x14a   : > { %3201 = vmatprep.subr.bf16.mxu0 %v3640_v30  ;;  %3225 = vmatprep.mubr.msk.bf16.mxu1 %vm3641_vm3, %v3640_v30  ;;  %v2989_v50 = vld [vmem:[%s3852_s30 + $0x4] ss:$0 sm:$0xff]  ;;  %v2980_v57 = vld [vmem:[%s3852_s30] ss:$0 sm:$0xff]  ;;  %v2998_v59 = vld [vmem:[%s3852_s30 + $0x8] ss:$0 sm:$0xff] }
 0x14b   : > { %v3493_v7 = vld [vmem:[%s3842_s26 + $0x90] sm:$0xff]   ;;  %v3494_v8 = vld [vmem:[%s3842_s26 + $0x98] sm:$0xff]   ;;  %vm1026_vm6 = vcmp.lt.s32.totalorder %v4009_v10, 5 }
 0x14d   : > { %v3935_v22 = vld [vmem:[#allocation2] sm:$0xff]  ;;  %3202 = vmatpush3.bf16.msra.mxu0 %v3486_v31  ;;  %s4356_s19 = scalar_lea.vmem %s4355_s5, %s3821_s0 }
 0x14e   : > { %v995_v23 = vsel %vm994_vm2, %v3935_v22, 0.0  ;;  %3207 = vmatprep.subr.bf16.mxu0 %v3640_v30  ;;  %v2978_v36 = vld [vmem:[%s4356_s19] ss:$0 sm:$0xff]  ;;  %s4358_s23 = scalar_lea.vmem %s4357_s29, %s3821_s0  ;;  %s4362_s19 = scalar_lea.vmem %s4292_s10, %s3821_s0 }
 0x14f   : > { %996 = vadd.xlane.f32.xlu0 %v995_v23  ;;  %v2979_v38 = vld [vmem:[%s4358_s23] ss:$0 sm:$0xff]  ;;  %v3027_v23 = vld [vmem:[%s3852_s30 + $0x9] ss:$0 sm:$0xff]  ;;  %s4363_s29 = scalar_lea.vmem %s4293_s11, %s3821_s0  ;;  %p3116_p1 = scmp.ne.s32.totalorder %s4366_s25, 1 }
 0x150   : > { %s4368_s5 = sld [smem:[#allocation29_spill]] (!%p3116_p1)  ;;  %vm2720_vm7 = vcmask (!%p3116_p1), 257024  }
 0x1dc   : > { %v997_v24 = vpop.xlane.xlu0 %996 }
 0x1dd   : > { %v999_v25 = vmul.f32 0.03125, %v997_v24 }
 0x1df   : > { %v1000_v26 = vsub.f32 %v3935_v22, %v999_v25 }
 0x1e1   : > { %v1001_v27 = vmul.f32 %v1000_v26, %v1000_v26 }
 0x1e3   : > { %v1002_v28 = vsel %vm994_vm2, %v1001_v27, 0.0 }
 0x1e4   : > { %1003 = vadd.xlane.f32.xlu0 %v1002_v28 }
 0x271   : > { %v1004_v32 = vpop.xlane.xlu0 %1003 }
 0x272   : > { %v1005_v33 = vmul.f32 0.03125, %v1004_v32 }
 0x274   : > { %v1006_v34 = vadd.f32 1e-06, %v1005_v33 }
 0x276   : > { %3519 = vrsqrt.f32 %v1006_v34 }
 0x280   : > { %v3520_v35 = vpop.eup %3519 }
 0x281   : > { %v1008_v37 = vmul.f32 %v3520_v35, %v1000_v26 }
 0x283   : > { %v1015_v39 = vmul.f32 %v2978_v36, %v1008_v37 }
 0x285   : > { %v1022_v40 = vadd.f32 %v2979_v38, %v1015_v39 }
 0x287   : > { %v3962_v42 = vpack.c.bf16 %v1022_v40, %v1022_v40  ;;  %v3495_v40 = vld [vmem:[%s3842_s26 + $0x50] sm:$0xff]  }
 0x289   : > { %3204 = vmatmul.mubr.msk.bf16.vlgmr.msra.gmra.mrb[0].mxu0 %vm994_vm2, %v3962_v42 }
 0x28a   : > { %3208 = vmatpush3.bf16.msra.mxu0 %v3487_v41  ;;  %3211 = vmatprep.mubr.msk.bf16.mxu0 %vm3641_vm3, %v3640_v30 }
 0x28b   : > { %3209 = vmatprep.subr.bf16.mxu0 %v3640_v30 }
 0x28e   : > { %3210 = vmatpush3.bf16.msra.mxu0 %v3488_v43  ;;  %v3496_v43 = vld [vmem:[%s3842_s26 + $0x58] sm:$0xff]  }
 0x28f   : > { %3215 = vmatprep.subr.bf16.mxu0 %v3640_v30 }
 0x291   : > { %3212 = vmatmul.mubr.msk.bf16.vlgmr.msra.gmra.mrb[4].mxu0 %vm994_vm2, %v3962_v42 }
 0x292   : > { %3216 = vmatpush3.bf16.msra.mxu0 %v3489_v44  ;;  %3219 = vmatprep.mubr.msk.bf16.mxu0 %vm3641_vm3, %v3640_v30 }
 0x293   : > { %3217 = vmatprep.subr.bf16.mxu0 %v3640_v30 }
 0x296   : > { %3218 = vmatpush3.bf16.msra.mxu0 %v3490_v45 }
 0x297   : > { %3229 = vmatprep.subr.bf16.mxu0 %v3640_v30 }
 0x299   : > { %3220 = vmatmul.mubr.msk.bf16.vlgmr.msra.gmra.mrb[8].mxu0 %vm994_vm2, %v3962_v42 }
 0x29a   : > { %3231 = vmatprep.mubr.msk.bf16.mxu0 %vm3641_vm3, %v3640_v30 }
 0x35c   : > { %v1087_v46 = vpop.f32.mrb[0].mxu0 }
 0x35d   : > { %v3205_v47 = vpop.f32.mrb[1].mxu0  ;;  %v1088_v60 = vadd.f32 %v2980_v57, %v1087_v46 }
 0x35e   : > { %v1090_v48 = vpop.f32.mrb[2].mxu0 }
 0x35f   : > { %v3206_v49 = vpop.f32.mrb[3].mxu0  ;;  %v1223_v2 = vpack.c.bf16 %v1088_v60, %v1088_v60  ;;  %v3018_v48 = vld [vmem:[%s3852_s30 + $0x5] ss:$0 sm:$0xff] }
 0x364   : > { %v1152_v51 = vpop.f32.mrb[4].mxu0 }
 0x365   : > { %v1153_v52 = vadd.f32 %v2989_v50, %v1152_v51  ;;  %v3213_v53 = vpop.f32.mrb[5].mxu0 }
 0x366   : > { %v1155_v54 = vpop.f32.mrb[6].mxu0 }
 0x367   : > { %v1224_v55 = vpack.c.bf16 %v1153_v52, %v1153_v52  ;;  %v3214_v56 = vpop.f32.mrb[7].mxu0 }
 0x369   : > { %v1230_v58 = vsel %vm1225_vm4, %v1224_v55, 0  ;;  %v3009_v55 = vld [vmem:[%s3852_s30 + $0x1] ss:$0 sm:$0xff] }
 0x36a   : > { %3224 = vmatpush3.bf16.xpose.msra.mxu1 %v1230_v58 }
 0x36b   : > { %3235 = vmatprep.subr.bf16.mxu1 %v3640_v30 }
 0x36c   : > { %v1217_v61 = vpop.f32.mrb[8].mxu0 }
 0x36d   : > { %v1218_v62 = vadd.f32 %v2998_v59, %v1217_v61  ;;  %v3221_v63 = vpop.f32.mrb[9].mxu0 }
 0x36e   : > { %v1220_v0 = vpop.f32.mrb[10].mxu0 }
 0x36f   : > { %v1286_v3 = vpack.c.bf16 %v1218_v62, %v1218_v62  ;;  %v3222_v4 = vpop.f32.mrb[11].mxu0 }
 0x371   : > { %v1292_v5 = vsel %vm1290_vm5, %v1286_v3, 0  ;;  %3226 = vmatmul.mubr.msk.bf16.vlgmr.msra.gmra.mrb[0].mxu1 %vm1225_vm4, %v1223_v2 }
 0x372   : > { %3230 = vmatpush3.bf16.msra.mxu0 %v1292_v5  ;;  %3236 = vmatpush3.bf16.msra.mxu1 %v3491_v1 }
 0x373   : > { %3237 = vmatprep.subr.bf16.mxu1 %v3640_v30  ;;  %3239 = vmatprep.mubr.msk.bf16.mxu1 %vm3641_vm3, %v3640_v30 }
 0x374   : > { %3243 = vmatprep.subr.bf16.mxu0 %v3640_v30 }
 0x376   : > { %3238 = vmatpush3.bf16.msra.mxu1 %v3492_v6 }
 0x377   : > { %3251 = vmatprep.subr.bf16.mxu1 %v3640_v30 }
 0x379   : > { %3240 = vmatmul.mubr.msk.bf16.vlgmr.msra.gmra.mrb[4].mxu1 %vm994_vm2, %v3962_v42 }
 0x37a   : > { %3252 = vmatpush3.bf16.msra.mxu1 %v3493_v7  ;;  %3255 = vmatprep.mubr.msk.bf16.mxu1 %vm3641_vm3, %v3640_v30  ;;  %v3033_v7 = vld [vmem:[%s4359_s3 + $0x4] sm:$0xf] }
 0x37b   : > { %3253 = vmatprep.subr.bf16.mxu1 %v3640_v30 }
 0x37e   : > { %3254 = vmatpush3.bf16.msra.mxu1 %v3494_v8  ;;  %v1647_v8 = vsel %vm1290_vm5, %v3033_v7, 0 }
 0x37f   : > { %3265 = vmatprep.subr.bf16.mxu1 %v3640_v30 }
 0x381   : > { %3256 = vmatmul.mubr.msk.bf16.vlgmr.msra.gmra.mrb[8].mxu1 %vm994_vm2, %v3962_v42 }
 0x382   : > { %3267 = vmatprep.mubr.msk.bf16.mxu1 %vm3641_vm3, %v3640_v30 }
 0x444   : > { %v1266_v11 = vpop.f32.mrb[0].mxu1 }
 0x445   : > { %v1272_v12 = vmul.f32 0.35355338, %v1266_v11  ;;  %v3227_v13 = vpop.f32.mrb[1].mxu1 }
 0x446   : > { %v1269_v14 = vpop.f32.mrb[2].mxu1 }
 0x447   : > { %v3228_v15 = vpop.f32.mrb[3].mxu1  ;;  %v1273_v16 = vsel %vm1026_vm6, %v1272_v12, -1e+30  ;;  %v1335_v12 = vld [vmem:[%s4359_s3] sm:$0xf] }
 0x448   : > { %v1274_v17 = vsel %vm1225_vm4, %v1273_v16, -inf  ;;  %v1693_v15 = vsel %vm1290_vm5, %v1335_v12, 0  ;;  %v3065_v12 = vld [vmem:[%s4359_s3 + $0x8] sm:$0xf] }
 0x449   : > { %1275 = vmax.xlane.f32.xlu1 %v1274_v17 }
 0x44c   : > { %v1395_v18 = vpop.f32.mrb[4].mxu1 }
 0x44d   : > { %v3241_v19 = vpop.f32.mrb[5].mxu1  ;;  %v1396_v57 = vadd.f32 %v3009_v55, %v1395_v18  ;;  %v3498_v18 = vld [vmem:[%s3842_s26 + $0x68] sm:$0xff]  }
 0x44e   : > { %v1398_v20 = vpop.f32.mrb[6].mxu1  ;;  %v3059_v55 = vld [vmem:[%s3852_s30 + $0xa] ss:$0 sm:$0xff] }
 0x44f   : > { %v3242_v21 = vpop.f32.mrb[7].mxu1  ;;  %v1531_v58 = vpack.c.bf16 %v1396_v57, %v1396_v57  ;;  %v3499_v20 = vld [vmem:[%s3842_s26 + $0x20] sm:$0xff]  }
 0x454   : > { %v1525_v24 = vpop.f32.mrb[8].mxu1 }
 0x455   : > { %v1526_v25 = vadd.f32 %v3027_v23, %v1525_v24  ;;  %v3257_v26 = vpop.f32.mrb[9].mxu1 }
 0x456   : > { %v1528_v27 = vpop.f32.mrb[10].mxu1  ;;  %v3500_v26 = vld [vmem:[%s3842_s26 + $0x28] sm:$0xff]  }
 0x457   : > { %v1593_v28 = vpack.c.bf16 %v1526_v25, %v1526_v25  ;;  %v3258_v29 = vpop.f32.mrb[11].mxu1 }
 0x459   : > { %v1598_v31 = vsel %vm1290_vm5, %v1593_v28, 0  ;;  %v3501_v28 = vld [vmem:[%s3842_s26 + $0xa0] sm:$0xff]  }
 0x45a   : > { %3266 = vmatpush3.bf16.msra.mxu1 %v1598_v31 }
 0x45b   : > { %3277 = vmatprep.subr.bf16.mxu1 %v3640_v30 }
 0x4d6   : > { %v1276_v32 = vpop.xlane.xlu1 %1275 }
 0x4d7   : > { %v1277_v33 = vsub.f32 %v1273_v16, %v1276_v32  ;;  %v3497_v16 = vld [vmem:[%s3842_s26 + $0x60] sm:$0xff]  }
 0x4d9   : > { %v1278_v34 = vmul.f32 1.442695, %v1277_v33  ;;  %v3502_v33 = vld [vmem:[%s3842_s26 + $0xa8] sm:$0xff]  }
 0x4db   : > { %3521 = vpow2.f32 %v1278_v34  ;;  %v3050_v34 = vld [vmem:[%s3852_s30 + $0x6] ss:$0 sm:$0xff] }
 0x4e5   : > { %v3522_v35 = vpop.eup %3521 }
 0x4e6   : > { %v1280_v36 = vsel %vm1225_vm4, %v3522_v35, 0.0 }
 0x4e7   : > { %1281 = vadd.xlane.f32.xlu1 %v1280_v36 }
 0x574   : > { %v1282_v37 = vpop.xlane.xlu1 %1281 }
 0x575   : > { %3523 = vrcp.f32 %v1282_v37 }
 0x57f   : > { %v3524_v38 = vpop.eup %3523 }
 0x580   : > { %v1284_v39 = vmul.f32 %v3524_v38, %v3522_v35 }
 0x582   : > { %v1285_v41 = vpack.c.bf16 %v1284_v39, %v1284_v39 }
 0x584   : > { %3232 = vmatmul.mubr.msk.bf16.vlgmr.msra.gmra.mrb[12].mxu0 %vm1225_vm4, %v1285_v41 }
 0x585   : > { %3244 = vmatpush3.bf16.msra.mxu0 %v3495_v40  ;;  %3247 = vmatprep.mubr.msk.bf16.mxu0 %vm3641_vm3, %v3640_v30 }
 0x586   : > { %3245 = vmatprep.subr.bf16.mxu0 %v3640_v30 }
 0x589   : > { %3246 = vmatpush3.bf16.msra.mxu0 %v3496_v43 }
 0x58a   : > { %3259 = vmatprep.subr.bf16.mxu0 %v3640_v30 }
 0x58c   : > { %3248 = vmatmul.mubr.msk.bf16.vlgmr.msra.gmra.mrb[16].mxu0 %vm994_vm2, %v3962_v42 }
 0x58d   : > { %3261 = vmatprep.mubr.msk.bf16.mxu0 %vm3641_vm3, %v3640_v30 }
 0x657   : > { %v1328_v44 = vpop.f32.mrb[12].mxu0 }
 0x658   : > { %v3233_v45 = vpop.f32.mrb[13].mxu0  ;;  %v1334_v17 = vpack.c.bf16 %v1328_v44, %v1328_v44 }
 0x659   : > { %v1331_v46 = vpop.f32.mrb[14].mxu0 }
 0x65a   : > { %v3234_v47 = vpop.f32.mrb[15].mxu0 }
 0x65f   : > { %v1460_v49 = vpop.f32.mrb[16].mxu0 }
 0x660   : > { %v1461_v50 = vadd.f32 %v3018_v48, %v1460_v49  ;;  %v3249_v51 = vpop.f32.mrb[17].mxu0  ;;  %v3041_v48 = vld [vmem:[%s3852_s30 + $0x2] ss:$0 sm:$0xff] }
 0x661   : > { %v1463_v52 = vpop.f32.mrb[18].mxu0 }
 0x662   : > { %v1532_v53 = vpack.c.bf16 %v1461_v50, %v1461_v50  ;;  %v3250_v54 = vpop.f32.mrb[19].mxu0 }
 0x664   : > { %v1537_v56 = vsel %vm1225_vm4, %v1532_v53, 0 }
 0x665   : > { %3260 = vmatpush3.bf16.xpose.msra.mxu0 %v1537_v56 }
 0x666   : > { %3271 = vmatprep.subr.bf16.mxu0 %v3640_v30 }
 0x66c   : > { %3262 = vmatmul.mubr.msk.bf16.vlgmr.msra.gmra.mrb[20].mxu0 %vm1225_vm4, %v1531_v58 }
 0x66d   : > { %3273 = vmatprep.mubr.msk.bf16.mxu0 %vm3641_vm3, %v3640_v30  ;;  %3272 = vmatpush3.bf16.msra.mxu0 %v1647_v8 }
 0x66e   : > { %3283 = vmatprep.subr.bf16.mxu0 %v3640_v30 }
 0x73f   : > { %v1573_v59 = vpop.f32.mrb[20].mxu0 }
 0x740   : > { %v1579_v60 = vmul.f32 0.35355338, %v1573_v59  ;;  %v3263_v61 = vpop.f32.mrb[21].mxu0 }
 0x741   : > { %v1576_v62 = vpop.f32.mrb[22].mxu0 }
 0x742   : > { %v3264_v63 = vpop.f32.mrb[23].mxu0  ;;  %v1580_v0 = vsel %vm1026_vm6, %v1579_v60, -1e+30 }
 0x743   : > { %v1581_v1 = vsel %vm1225_vm4, %v1580_v0, -inf }
 0x744   : > { %1582 = vmax.xlane.f32.xlu0 %v1581_v1 }
 0x7d1   : > { %v1583_v2 = vpop.xlane.xlu0 %1582 }
 0x7d2   : > { %v1584_v3 = vsub.f32 %v1580_v0, %v1583_v2 }
 0x7d4   : > { %v1585_v4 = vmul.f32 1.442695, %v1584_v3 }
 0x7d6   : > { %3525 = vpow2.f32 %v1585_v4 }
 0x7e0   : > { %v3526_v5 = vpop.eup %3525 }
 0x7e1   : > { %v1587_v6 = vsel %vm1225_vm4, %v3526_v5, 0.0 }
 0x7e2   : > { %1588 = vadd.xlane.f32.xlu1 %v1587_v6 }
 0x86f   : > { %v1589_v9 = vpop.xlane.xlu1 %1588 }
 0x870   : > { %3527 = vrcp.f32 %v1589_v9 }
 0x87a   : > { %v3528_v11 = vpop.eup %3527 }
 0x87b   : > { %v1591_v13 = vmul.f32 %v3528_v11, %v3526_v5 }
 0x87d   : > { %v1592_v14 = vpack.c.bf16 %v1591_v13, %v1591_v13  ;;  %v2046_v13 = vsel %vm1290_vm5, %v3065_v12, 0 }
 0x87f   : > { %3268 = vmatmul.mubr.msk.bf16.vlgmr.msra.gmra.mrb[12].mxu1 %vm1225_vm4, %v1592_v14 }
 0x880   : > { %3278 = vmatpush3.bf16.msra.mxu1 %v1693_v15  ;;  %3279 = vmatprep.mubr.msk.bf16.mxu1 %vm3641_vm3, %v3640_v30 }
 0x881   : > { %3291 = vmatprep.subr.bf16.mxu1 %v3640_v30 }
 0x887   : > { %3280 = vmatmul.mubr.msk.bf16.vlgmr.msra.gmra.mrb[16].mxu1 %vm1225_vm4, %v1334_v17  ;;  %v3503_v17 = vld [vmem:[%s3842_s26 + $0x30] sm:$0xff]  }
 0x888   : > { %3292 = vmatpush3.bf16.msra.mxu1 %v3497_v16  ;;  %3295 = vmatprep.mubr.msk.bf16.mxu1 %vm3641_vm3, %v3640_v30 }
 0x889   : > { %3293 = vmatprep.subr.bf16.mxu1 %v3640_v30 }
 0x88c   : > { %3294 = vmatpush3.bf16.msra.mxu1 %v3498_v18 }
 0x88d   : > { %3307 = vmatprep.subr.bf16.mxu1 %v3640_v30 }
 0x88f   : > { %3296 = vmatmul.mubr.msk.bf16.vlgmr.msra.gmra.mrb[20].mxu1 %vm994_vm2, %v3962_v42 }
 0x890   : > { %3309 = vmatprep.mubr.msk.bf16.mxu1 %vm3641_vm3, %v3640_v30 }
 0x952   : > { %v1634_v19 = vpop.f32.mrb[12].mxu1 }
 0x953   : > { %v1640_v21 = vpack.c.bf16 %v1634_v19, %v1634_v19  ;;  %v3269_v23 = vpop.f32.mrb[13].mxu1  ;;  %v3504_v19 = vld [vmem:[%s3842_s26 + $0x38] sm:$0xff]  }
 0x954   : > { %v1637_v24 = vpop.f32.mrb[14].mxu1 }
 0x955   : > { %v3270_v25 = vpop.f32.mrb[15].mxu1  ;;  %3274 = vmatmul.mubr.msk.bf16.vlgmr.msra.gmra.mrb[24].mxu0 %vm1225_vm4, %v1640_v21  ;;  %v3506_v21 = vld [vmem:[%s3842_s26 + $0xb8] sm:$0xff]   ;;  %v3507_v24 = vld [vmem:[%s3842_s26 + $0x70] sm:$0xff]  }
 0x956   : > { %3284 = vmatpush3.bf16.msra.mxu0 %v3499_v20  ;;  %3287 = vmatprep.mubr.msk.bf16.mxu0 %vm3641_vm3, %v3640_v30  ;;  %v3505_v20 = vld [vmem:[%s3842_s26 + $0xb0] sm:$0xff]  }
 0x957   : > { %3285 = vmatprep.subr.bf16.mxu0 %v3640_v30 }
 0x95a   : > { %v1729_v27 = vpop.f32.mrb[16].mxu1  ;;  %3286 = vmatpush3.bf16.msra.mxu0 %v3500_v26 }
 0x95b   : > { %v3281_v29 = vpop.f32.mrb[17].mxu1  ;;  %3299 = vmatprep.subr.bf16.mxu0 %v3640_v30 }
 0x95c   : > { %v1732_v31 = vpop.f32.mrb[18].mxu1  ;;  %v3508_v29 = vld [vmem:[%s3842_s26 + $0x78] sm:$0xff]  }
 0x95d   : > { %v3282_v32 = vpop.f32.mrb[19].mxu1  ;;  %3288 = vmatmul.mubr.msk.bf16.vlgmr.msra.gmra.mrb[28].mxu0 %vm994_vm2, %v3962_v42 }
 0x95e   : > { %3300 = vmatpush3.bf16.msra.mxu0 %v3501_v28  ;;  %3303 = vmatprep.mubr.msk.bf16.mxu0 %vm3641_vm3, %v3640_v30 }
 0x95f   : > { %3301 = vmatprep.subr.bf16.mxu0 %v3640_v30 }
 0x962   : > { %v1859_v35 = vpop.f32.mrb[20].mxu1  ;;  %3302 = vmatpush3.bf16.msra.mxu0 %v3502_v33 }
 0x963   : > { %v1860_v36 = vadd.f32 %v3050_v34, %v1859_v35  ;;  %v3297_v37 = vpop.f32.mrb[21].mxu1  ;;  %3313 = vmatprep.subr.bf16.mxu0 %v3640_v30  ;;  %v3090_v35 = vld [vmem:[%s3852_s30 + $0xb] ss:$0 sm:$0xff] }
 0x964   : > { %v1862_v38 = vpop.f32.mrb[22].mxu1 }
 0x965   : > { %v1931_v39 = vpack.c.bf16 %v1860_v36, %v1860_v36  ;;  %v3298_v40 = vpop.f32.mrb[23].mxu1  ;;  %3304 = vmatmul.mubr.msk.bf16.vlgmr.msra.gmra.mrb[32].mxu0 %vm994_vm2, %v3962_v42 }
 0x966   : > { %3315 = vmatprep.mubr.msk.bf16.mxu0 %vm3641_vm3, %v3640_v30 }
 0x967   : > { %v1936_v41 = vsel %vm1225_vm4, %v1931_v39, 0 }
 0x968   : > { %3308 = vmatpush3.bf16.xpose.msra.mxu1 %v1936_v41 }
 0x969   : > { %3319 = vmatprep.subr.bf16.mxu1 %v3640_v30 }
 0xa28   : > { %v1683_v43 = vpop.f32.mrb[24].mxu0 }
 0xa29   : > { %v4083_v44 = vadd.f32 %v1729_v27, %v1683_v43  ;;  %v3275_v45 = vpop.f32.mrb[25].mxu0 }
 0xa2a   : > { %v1686_v46 = vpop.f32.mrb[26].mxu0 }
 0xa2b   : > { %v3276_v47 = vpop.f32.mrb[27].mxu0 }
 0xa30   : > { %v1794_v49 = vpop.f32.mrb[28].mxu0 }
 0xa31   : > { %v1795_v50 = vadd.f32 %v3041_v48, %v1794_v49  ;;  %v3289_v51 = vpop.f32.mrb[29].mxu0  ;;  %v3081_v49 = vld [vmem:[%s3852_s30 + $0x7] ss:$0 sm:$0xff] }
 0xa32   : > { %v1797_v52 = vpop.f32.mrb[30].mxu0 }
 0xa33   : > { %v1930_v53 = vpack.c.bf16 %v1795_v50, %v1795_v50  ;;  %v3290_v54 = vpop.f32.mrb[31].mxu0 }
 0xa35   : > { %3310 = vmatmul.mubr.msk.bf16.vlgmr.msra.gmra.mrb[24].mxu1 %vm1225_vm4, %v1930_v53 }
 0xa36   : > { %3321 = vmatprep.mubr.msk.bf16.mxu1 %vm3641_vm3, %v3640_v30  ;;  %3320 = vmatpush3.bf16.msra.mxu1 %v2046_v13 }
 0xa37   : > { %3333 = vmatprep.subr.bf16.mxu1 %v3640_v30 }
 0xa38   : > { %v1924_v56 = vpop.f32.mrb[32].mxu0 }
 0xa39   : > { %v1925_v57 = vadd.f32 %v3059_v55, %v1924_v56  ;;  %v3305_v58 = vpop.f32.mrb[33].mxu0  ;;  %v3072_v56 = vld [vmem:[%s3852_s30 + $0x3] ss:$0 sm:$0xff] }
 0xa3a   : > { %v1927_v59 = vpop.f32.mrb[34].mxu0 }
 0xa3b   : > { %v1992_v60 = vpack.c.bf16 %v1925_v57, %v1925_v57  ;;  %v3306_v61 = vpop.f32.mrb[35].mxu0 }
 0xa3d   : > { %v1997_v62 = vsel %vm1290_vm5, %v1992_v60, 0 }
 0xa3e   : > { %3314 = vmatpush3.bf16.msra.mxu0 %v1997_v62 }
 0xa3f   : > { %3325 = vmatprep.subr.bf16.mxu0 %v3640_v30 }
 0xb08   : > { %v1972_v63 = vpop.f32.mrb[24].mxu1 }
 0xb09   : > { %v1978_v0 = vmul.f32 0.35355338, %v1972_v63  ;;  %v3311_v1 = vpop.f32.mrb[25].mxu1 }
 0xb0a   : > { %v1975_v2 = vpop.f32.mrb[26].mxu1 }
 0xb0b   : > { %v3312_v3 = vpop.f32.mrb[27].mxu1  ;;  %v1979_v4 = vsel %vm1026_vm6, %v1978_v0, -1e+30 }
 0xb0c   : > { %v1980_v5 = vsel %vm1225_vm4, %v1979_v4, -inf }
 0xb0d   : > { %1981 = vmax.xlane.f32.xlu0 %v1980_v5 }
 0xb9a   : > { %v1982_v6 = vpop.xlane.xlu0 %1981 }
 0xb9b   : > { %v1983_v7 = vsub.f32 %v1979_v4, %v1982_v6 }
 0xb9d   : > { %v1984_v8 = vmul.f32 1.442695, %v1983_v7  ;;  %v3096_v7 = vld [vmem:[%s4359_s3 + $0xc] sm:$0xf]  ;;  %s4364_s3 = scalar_lea.vmem %s4295_s13, %s3821_s0 }
 0xb9f   : > { %3529 = vpow2.f32 %v1984_v8  ;;  %v2400_v8 = vsel %vm1290_vm5, %v3096_v7, 0 }
 0xba9   : > { %v3530_v9 = vpop.eup %3529 }
 0xbaa   : > { %v1986_v11 = vsel %vm1225_vm4, %v3530_v9, 0.0 }
 0xbab   : > { %1987 = vadd.xlane.f32.xlu1 %v1986_v11 }
 0xc38   : > { %v1988_v14 = vpop.xlane.xlu1 %1987 }
 0xc39   : > { %3531 = vrcp.f32 %v1988_v14 }
 0xc43   : > { %v3532_v15 = vpop.eup %3531 }
 0xc44   : > { %v1990_v16 = vmul.f32 %v3532_v15, %v3530_v9 }
 0xc46   : > { %v1991_v18 = vpack.c.bf16 %v1990_v16, %v1990_v16 }
 0xc48   : > { %3316 = vmatmul.mubr.msk.bf16.vlgmr.msra.gmra.mrb[36].mxu0 %vm1225_vm4, %v1991_v18 }
 0xc49   : > { %3326 = vmatpush3.bf16.msra.mxu0 %v3503_v17  ;;  %3329 = vmatprep.mubr.msk.bf16.mxu0 %vm3641_vm3, %v3640_v30 }
 0xc4a   : > { %3327 = vmatprep.subr.bf16.mxu0 %v3640_v30 }
 0xc4d   : > { %3328 = vmatpush3.bf16.msra.mxu0 %v3504_v19  ;;  %v3098_v19 = vld [vmem:[%s4360_s27] ss:$0 sm:$0xff] }
 0xc4e   : > { %3341 = vmatprep.subr.bf16.mxu0 %v3640_v30 }
 0xc50   : > { %3330 = vmatmul.mubr.msk.bf16.vlgmr.msra.gmra.mrb[40].mxu0 %vm994_vm2, %v3962_v42 }
 0xc51   : > { %3342 = vmatpush3.bf16.msra.mxu0 %v3505_v20  ;;  %3345 = vmatprep.mubr.msk.bf16.mxu0 %vm3641_vm3, %v3640_v30 }
 0xc52   : > { %3343 = vmatprep.subr.bf16.mxu0 %v3640_v30 }
 0xc55   : > { %3344 = vmatpush3.bf16.msra.mxu0 %v3506_v21 }
 0xc56   : > { %3355 = vmatprep.subr.bf16.mxu0 %v3640_v30 }
 0xc58   : > { %3346 = vmatmul.mubr.msk.bf16.vlgmr.msra.gmra.mrb[44].mxu0 %vm994_vm2, %v3962_v42 }
 0xc59   : > { %3357 = vmatprep.mubr.msk.bf16.mxu0 %vm3641_vm3, %v3640_v30 }
 0xd1b   : > { %v2033_v23 = vpop.f32.mrb[36].mxu0 }
 0xd1c   : > { %v2039_v25 = vpack.c.bf16 %v2033_v23, %v2033_v23  ;;  %v3317_v26 = vpop.f32.mrb[37].mxu0  ;;  %v3099_v23 = vld [vmem:[%s4361_s4] ss:$0 sm:$0xff] }
 0xd1d   : > { %v2036_v27 = vpop.f32.mrb[38].mxu0 }
 0xd1e   : > { %v3318_v28 = vpop.f32.mrb[39].mxu0  ;;  %3322 = vmatmul.mubr.msk.bf16.vlgmr.msra.gmra.mrb[28].mxu1 %vm1225_vm4, %v2039_v25 }
 0xd1f   : > { %3334 = vmatpush3.bf16.msra.mxu1 %v3507_v24  ;;  %3337 = vmatprep.mubr.msk.bf16.mxu1 %vm3641_vm3, %v3640_v30 }
 0xd20   : > { %3335 = vmatprep.subr.bf16.mxu1 %v3640_v30 }
 0xd23   : > { %v2148_v31 = vpop.f32.mrb[40].mxu0  ;;  %3336 = vmatpush3.bf16.msra.mxu1 %v3508_v29 }
 0xd24   : > { %v3331_v32 = vpop.f32.mrb[41].mxu0  ;;  %3349 = vmatprep.subr.bf16.mxu1 %v3640_v30  ;;  %v2149_v58 = vadd.f32 %v3072_v56, %v2148_v31  ;;  %v3102_v56 = vld [vmem:[%s4364_s3] ss:$0 sm:$0xff] }
 0xd25   : > { %v2151_v33 = vpop.f32.mrb[42].mxu0 }
 0xd26   : > { %v3332_v34 = vpop.f32.mrb[43].mxu0  ;;  %3338 = vmatmul.mubr.msk.bf16.vlgmr.msra.gmra.mrb[32].mxu1 %vm994_vm2, %v3962_v42  ;;  %v2284_v59 = vpack.c.bf16 %v2149_v58, %v2149_v58 }
 0xd27   : > { %3351 = vmatprep.mubr.msk.bf16.mxu1 %vm3641_vm3, %v3640_v30 }
 0xd2b   : > { %v2278_v36 = vpop.f32.mrb[44].mxu0 }
 0xd2c   : > { %v2279_v37 = vadd.f32 %v3090_v35, %v2278_v36  ;;  %v3347_v38 = vpop.f32.mrb[45].mxu0  ;;  %v3509_v36 = vld [vmem:[%s3873_s17] sm:$0xff]  }
 0xd2d   : > { %v2281_v39 = vpop.f32.mrb[46].mxu0 }
 0xd2e   : > { %v2346_v40 = vpack.c.bf16 %v2279_v37, %v2279_v37  ;;  %v3348_v41 = vpop.f32.mrb[47].mxu0 }
 0xd2f   : > { %v3100_v41 = vld [vmem:[%s4362_s19] ss:$0 sm:$0xff] }
 0xd30   : > { %v2351_v43 = vsel %vm1290_vm5, %v2346_v40, 0 }
 0xd31   : > { %3356 = vmatpush3.bf16.msra.mxu0 %v2351_v43 }
 0xd32   : > { %3367 = vmatprep.subr.bf16.mxu0 %v3640_v30 }
 0xdf1   : > { %v2082_v45 = vpop.f32.mrb[28].mxu1 }
 0xdf2   : > { %v2088_v42 = vadd.f32 %v2082_v45, %v4083_v44  ;;  %v3323_v46 = vpop.f32.mrb[29].mxu1  ;;  %v3101_v45 = vld [vmem:[%s4363_s29] ss:$0 sm:$0xff] }
 0xdf3   : > { %v2085_v47 = vpop.f32.mrb[30].mxu1 }
 0xdf4   : > { %v3324_v48 = vpop.f32.mrb[31].mxu1 }
 0xdf5   : > { %v3511_v48 = vld [vmem:[%s3883_s16] sm:$0xff]  }
 0xdf9   : > { %v2213_v50 = vpop.f32.mrb[32].mxu1 }
 0xdfa   : > { %v2214_v51 = vadd.f32 %v3081_v49, %v2213_v50  ;;  %v3339_v52 = vpop.f32.mrb[33].mxu1  ;;  %v3512_v49 = vld [vmem:[%s3883_s16 + $0x8] sm:$0xff]   ;;  %v3513_v50 = vld [vmem:[%s3883_s16 + $0x10] sm:$0xff]  }
 0xdfb   : > { %v2216_v53 = vpop.f32.mrb[34].mxu1  ;;  %v3515_v52 = vld [vmem:[%s3883_s16 + $0x20] sm:$0xff]  }
 0xdfc   : > { %v2285_v54 = vpack.c.bf16 %v2214_v51, %v2214_v51  ;;  %v3340_v55 = vpop.f32.mrb[35].mxu1  ;;  %v3514_v51 = vld [vmem:[%s3883_s16 + $0x18] sm:$0xff]   ;;  %v3516_v53 = vld [vmem:[%s3883_s16 + $0x28] sm:$0xff]  }
 0xdfd   : > { %v3518_v55 = vld [vmem:[%s3883_s16 + $0x38] sm:$0xff]  }
 0xdfe   : > { %v2290_v57 = vsel %vm1225_vm4, %v2285_v54, 0  ;;  %v3517_v54 = vld [vmem:[%s3883_s16 + $0x30] sm:$0xff]  }
 0xdff   : > { %3350 = vmatpush3.bf16.xpose.msra.mxu1 %v2290_v57 }
 0xe00   : > { %3361 = vmatprep.subr.bf16.mxu1 %v3640_v30 }
 0xe06   : > { %3352 = vmatmul.mubr.msk.bf16.vlgmr.msra.gmra.mrb[36].mxu1 %vm1225_vm4, %v2284_v59 }
 0xe07   : > { %3363 = vmatprep.mubr.msk.bf16.mxu1 %vm3641_vm3, %v3640_v30  ;;  %3362 = vmatpush3.bf16.msra.mxu1 %v2400_v8  ;;  %v3115_v8 = vld [vmem:[%s835_s20] ss:$0 sm:$0xff]  ;;  %s4367_s20 = sld [smem:[#allocation28_spill]] (!%p3116_p1) }
 0xe08   : > { %3375 = vmatprep.subr.bf16.mxu1 %v3640_v30 }
 0xed9   : > { %v2326_v44 = vpop.f32.mrb[36].mxu1 }
 0xeda   : > { %v2332_v60 = vmul.f32 0.35355338, %v2326_v44  ;;  %v3353_v61 = vpop.f32.mrb[37].mxu1 }
 0xedb   : > { %v2329_v62 = vpop.f32.mrb[38].mxu1 }
 0xedc   : > { %v3354_v63 = vpop.f32.mrb[39].mxu1  ;;  %v2333_v0 = vsel %vm1026_vm6, %v2332_v60, -1e+30 }
 0xedd   : > { %v2334_v1 = vsel %vm1225_vm4, %v2333_v0, -inf }
 0xede   : > { %2335 = vmax.xlane.f32.xlu0 %v2334_v1 }
 0xf6b   : > { %v2336_v2 = vpop.xlane.xlu0 %2335 }
 0xf6c   : > { %v2337_v3 = vsub.f32 %v2333_v0, %v2336_v2 }
 0xf6e   : > { %v2338_v4 = vmul.f32 1.442695, %v2337_v3 }
 0xf70   : > { %3533 = vpow2.f32 %v2338_v4 }
 0xf7a   : > { %v3534_v5 = vpop.eup %3533 }
 0xf7b   : > { %v2340_v6 = vsel %vm1225_vm4, %v3534_v5, 0.0 }
 0xf7c   : > { %2341 = vadd.xlane.f32.xlu1 %v2340_v6  ;;  %v3106_v6 = vld [vmem:[%s832_s2] ss:$0 sm:$0xff] }
0x1009   : > { %v2342_v10 = vpop.xlane.xlu1 %2341 }
0x100a   : > { %3535 = vrcp.f32 %v2342_v10 }
0x1014   : > { %v3536_v9 = vpop.eup %3535 }
0x1015   : > { %v2344_v11 = vmul.f32 %v3536_v9, %v3534_v5 }
0x1017   : > { %v2345_v12 = vpack.c.bf16 %v2344_v11, %v2344_v11 }
0x1019   : > { %3358 = vmatmul.mubr.msk.bf16.vlgmr.msra.gmra.mrb[48].mxu0 %vm1225_vm4, %v2345_v12 }
0x101a   : > { %3371 = vmatprep.mubr.msk.bf16.mxu0 %vm3641_vm3, %v3640_v30  ;;  %3368 = vmatpush3.bf16.msra.mxu0 %v3509_v36 }
0x101b   : > { %3369 = vmatprep.subr.bf16.mxu0 %v3640_v30 }
0x10ec   : > { %v2387_v13 = vpop.f32.mrb[48].mxu0 }
0x10ed   : > { %v2393_v14 = vpack.c.bf16 %v2387_v13, %v2387_v13  ;;  %v3359_v15 = vpop.f32.mrb[49].mxu0 }
0x10ee   : > { %v2390_v16 = vpop.f32.mrb[50].mxu0 }
0x10ef   : > { %v3360_v17 = vpop.f32.mrb[51].mxu0  ;;  %3364 = vmatmul.mubr.msk.bf16.vlgmr.msra.gmra.mrb[40].mxu1 %vm1225_vm4, %v2393_v14 }
0x10f0   : > { %3391 = vmatprep.mubr.msk.bf16.mxu1 %vm3641_vm3, %v3640_v30  ;;  %3376 = vmatpush3.bf16.msra.mxu1 %v3511_v48 }
0x10f1   : > { %3377 = vmatprep.subr.bf16.mxu1 %v3640_v30 }
0x10f4   : > { %3378 = vmatpush3.bf16.msra.mxu1 %v3512_v49 }
0x10f5   : > { %3379 = vmatprep.subr.bf16.mxu1 %v3640_v30 }
0x10f8   : > { %3380 = vmatpush3.bf16.msra.mxu1 %v3513_v50 }
0x10f9   : > { %3381 = vmatprep.subr.bf16.mxu1 %v3640_v30 }
0x10fc   : > { %3382 = vmatpush3.bf16.msra.mxu1 %v3514_v51 }
0x10fd   : > { %3383 = vmatprep.subr.bf16.mxu1 %v3640_v30 }
0x1100   : > { %3384 = vmatpush3.bf16.msra.mxu1 %v3515_v52 }
0x1101   : > { %3385 = vmatprep.subr.bf16.mxu1 %v3640_v30 }
0x1104   : > { %3386 = vmatpush3.bf16.msra.mxu1 %v3516_v53 }
0x1105   : > { %3387 = vmatprep.subr.bf16.mxu1 %v3640_v30 }
0x1108   : > { %3388 = vmatpush3.bf16.msra.mxu1 %v3517_v54 }
0x1109   : > { %3389 = vmatprep.subr.bf16.mxu1 %v3640_v30 }
0x110c   : > { %3390 = vmatpush3.bf16.msra.mxu1 %v3518_v55 }
0x11c2   : > { %v2436_v18 = vpop.f32.mrb[40].mxu1 }
0x11c3   : > { %v2442_v20 = vadd.f32 %v2436_v18, %v2088_v42  ;;  %v3365_v21 = vpop.f32.mrb[41].mxu1 }
0x11c4   : > { %v2439_v24 = vpop.f32.mrb[42].mxu1 }
0x11c5   : > { %v2450_v25 = vadd.f32 %v3098_v19, %v2442_v20  ;;  %v3366_v26 = vpop.f32.mrb[43].mxu1 }
0x11c6   : > { %v3117_v26 = vld [vmem:[%s4367_s20] ss:$0 sm:$0xff] (!%p3116_p1) }
0x11c7   : > { %v2458_v27 = vmul.f32 %v3099_v23, %v2450_v25 }
0x11c9   : > { %v4164_v28 = vadd.f32 %v2458_v27, %v3935_v22  ;;  %v3510_v22 = vld [vmem:[%s3873_s17 + $0x8] sm:$0xff]  }
0x11ca   : > { %3370 = vmatpush3.bf16.msra.mxu0 %v3510_v22 }
0x11cb   : > { %v2462_v29 = vsel %vm994_vm2, %v4164_v28, 0.0 }
0x11cc   : > { %2463 = vadd.xlane.f32.xlu0 %v2462_v29 }
0x1259   : > { %v2464_v31 = vpop.xlane.xlu0 %2463 }
0x125a   : > { %v2465_v32 = vmul.f32 0.03125, %v2464_v31 }
0x125c   : > { %v2466_v33 = vsub.f32 %v4164_v28, %v2465_v32 }
0x125e   : > { %v2467_v34 = vmul.f32 %v2466_v33, %v2466_v33 }
0x1260   : > { %v2468_v35 = vsel %vm994_vm2, %v2467_v34, 0.0 }
0x1261   : > { %2469 = vadd.xlane.f32.xlu1 %v2468_v35 }
0x12ee   : > { %v2470_v37 = vpop.xlane.xlu1 %2469 }
0x12ef   : > { %v2471_v38 = vmul.f32 0.03125, %v2470_v37 }
0x12f1   : > { %v2472_v39 = vadd.f32 1e-06, %v2471_v38 }
0x12f3   : > { %3537 = vrsqrt.f32 %v2472_v39 }
0x12fd   : > { %v3538_v40 = vpop.eup %3537 }
0x12fe   : > { %v2474_v43 = vmul.f32 %v3538_v40, %v2466_v33 }
0x1300   : > { %v2481_v42 = vmul.f32 %v3100_v41, %v2474_v43 }
0x1302   : > { %v2488_v46 = vadd.f32 %v3101_v45, %v2481_v42 }
0x1304   : > { %v2489_v47 = vpack.c.bf16 %v2488_v46, %v2488_v46 }
0x1306   : > { %3372 = vmatmul.mubr.msk.bf16.vlgmr.msra.gmra.mrb[52].mxu0 %vm994_vm2, %v2489_v47 }
0x13d9   : > { %v2550_v57 = vpop.f32.mrb[52].mxu0 }
0x13da   : > { %v2551_v58 = vadd.f32 %v3102_v56, %v2550_v57  ;;  %v3373_v59 = vpop.f32.mrb[53].mxu0 }
0x13db   : > { %v2553_v44 = vpop.f32.mrb[54].mxu0 }
0x13dc   : > { %v2556_v60 = vmul.f32 %v2551_v58, %v2551_v58  ;;  %v3374_v61 = vpop.f32.mrb[55].mxu0 }
0x13de   : > { %v2557_v62 = vmul.f32 %v2556_v60, %v2551_v58 }
0x13e0   : > { %v2558_v63 = vmul.f32 0.044715, %v2557_v62 }
0x13e2   : > { %v2559_v0 = vadd.f32 %v2558_v63, %v2551_v58 }
0x13e4   : > { %v2560_v1 = vmul.f32 0.7978846, %v2559_v0 }
0x13e6   : > { %3539 = vtanh.f32 %v2560_v1 }
0x13f0   : > { %v3540_v30 = vpop.eup %3539 }
0x13f1   : > { %v2562_v2 = vadd.f32 1.0, %v3540_v30 }
0x13f3   : > { %v2563_v3 = vmul.f32 0.5, %v2562_v2 }
0x13f5   : > { %v2564_v4 = vmul.f32 %v2563_v3, %v2551_v58 }
0x13f7   : > { %v2565_v5 = vpack.c.bf16 %v2564_v4, %v2564_v4 }
0x13f9   : > { %3392 = vmatmul.mubr.bf16.vlgmr.msra.gmra.mrb[44].mxu1 %v2565_v5 }
0x14cc   : > { %v2671_v7 = vpop.f32.mrb[44].mxu1 }
0x14cd   : > { %v2672_v10 = vadd.f32 %v3106_v6, %v2671_v7  ;;  %v3393_v9 = vpop.f32.mrb[45].mxu1  ;;  %2690 = sbr.rel (%p3116_p1) target bundleno = 5645 (0x160d), region = 104 }
0x14ce   : > { %v2674_v11 = vpop.f32.mrb[46].mxu1 }
0x14cf   : > { %v2684_v12 = vmul.f32 %v3115_v8, %v2672_v10  ;;  %v3394_v13 = vpop.f32.mrb[47].mxu1 }
0x14d1   : > { %v2685_v14 = vadd.f32 %v2684_v12, %v4164_v28  ;;  %v3118_v28 = vld [vmem:[%s4368_s5] ss:$0 sm:$0xff] (!%p3116_p1) }
0x14d3   : > { %2686 = vst.msk [vmem:[#allocation2] sm:$0xff] %vm994_vm2, %v2685_v14  ;;  %v2693_v15 = vsel (!%p3116_p1), %vm994_vm2, %v2685_v14, 0.0 }
0x14d4   : > { %2694 = vadd.xlane.f32.xlu0 %v2693_v15 }
0x1561   : > { %v2695_v16 = vpop.xlane.xlu0 %2694 }
0x1562   : > { %v2696_v17 = vmul.f32 0.03125, %v2695_v16 }
0x1564   : > { %v2697_v18 = vsub.f32 %v2685_v14, %v2696_v17 }
0x1566   : > { %v2698_v19 = vmul.f32 %v2697_v18, %v2697_v18 }
0x1568   : > { %v2699_v20 = vsel %vm994_vm2, %v2698_v19, 0.0 }
0x1569   : > { %2700 = vadd.xlane.f32.xlu0 %v2699_v20 }
0x15f6   : > { %v2701_v21 = vpop.xlane.xlu0 %2700 }
0x15f7   : > { %v2702_v23 = vmul.f32 0.03125, %v2701_v21 }
0x15f9   : > { %v2703_v24 = vadd.f32 1e-06, %v2702_v23 }
0x15fb   : > { %3541 = vrsqrt.f32 %v2703_v24 }
0x1605   : > { %v3542_v25 = vpop.eup %3541 }
0x1606   : > { %v2705_v27 = vmul.f32 %v3542_v25, %v2697_v18 }
0x1608   : > { %v2712_v29 = vmul.f32 %v3117_v26, %v2705_v27 }
0x160a   : > { %v2719_v31 = vadd.f32 %v3118_v28, %v2712_v29 }
0x160c   : > { %2721 = vst.msk [vmem:[%s779_s28] sm:$0xf] %vm2720_vm7, %v2719_v31 }
0x160d PF: > { %s4369_s19 = sld [smem:[#allocation10_spill]]  ;;  %s4370_s18 = sld [smem:[#allocation7_spill]] }
0x160e   : > { %s4372_s3 = sld [smem:[#allocation30_spill]]  ;;  %s2736_s26 = sshll.u32 %s779_s28, 4  ;;  %s2737_s26 = int_to_ptr.vmem [resolvable:$true] %s2736_s26 }
0x160f   : > { %s3543_s1 = scalar_lea.vmem %s2737_s26, 64  ;;  %s3642_s25 = smov [#allocation3]  }
0x1610   : > { %p3544_p2 = scmp.ne.s32.totalorder %s2737_s26, %s3543_s1  ;;  %s3547_s0 = sshll.u32 %s3642_s25, 4  ;;  %s3548_s0 = int_to_ptr.vmem [resolvable:$false] %s3547_s0 }
0x1611   : > { %s3549_s2 = scalar_lea.vmem %s3548_s0, 128  ;;  %p3550_p6 = scmp.lt.s32.totalorder %s2737_s26, %s3548_s0 }
0x1612   : > { %p3545_p4 = pnand %p3544_p2, %p3792_p3  ;;  %p3551_p7 = scmp.lt.s32.totalorder %s3549_s2, %s3543_s1 }
0x1613   : > { %s3120_s29 = sshll.u32 %s4369_s19, 6  ;;  %s4373_s30 = sand.u32 1, %s4370_s18  }
0x1614   : > { %s4231_s16 = scalar_lea.hbm %s4372_s3, %s3120_s29  ;;  %s2723_s27 = scalar_lea.sflag [#allocation4], %s4373_s30 }
0x1615   : > { %p3546_p5 = pneg %p3545_p4  ;;  %p3552_p8 = por %p3551_p7, %p3550_p6 }
0x1617   : > { %p3553_p10 = pnand %p3552_p8, %p3546_p5 }
0x1619   : > { %3556 = shalt.err (!%p3553_p10)
}
0x161a   : > { %s3557_s22 = scalar_lea.hbm %s4231_s16, 64  ;;  %s3561_s4 = scalar_lea.hbm %s4372_s3, 128 }
0x161b   : > { %p3558_p11 = scmp.ne.s32.totalorder %s4231_s16, %s3557_s22  ;;  %p3562_p0 = scmp.lt.u32.totalorder %s4231_s16, %s4372_s3 }
0x161c   : > { %p3563_p1 = scmp.lt.u32.totalorder %s3561_s4, %s3557_s22  ;;  %p3565_p4 = scmp.lt.u32.totalorder %s3557_s22, %s4231_s16 }
0x161d   : > { %p3559_p12 = pnand %p3558_p11, %p3792_p3 }
0x161e   : > { %p3564_p2 = por %p3563_p1, %p3562_p0 }
0x161f   : > { %p3560_p13 = pneg %p3559_p12 }
0x1620   : > { %p3566_p5 = por %p3565_p4, %p3564_p2 }
0x1622   : > { %p3567_p6 = pnand %p3566_p5, %p3560_p13 }
0x1624   : > { %3570 = shalt.err (!%p3567_p6)
}
0x1625   : > { %3397 = dma.vmem_to_hbm [thread:$0]  (%p3792_p3), %s2737_s26, 64, %s4231_s16, %s2723_s27  }
0x1626 PF: > { %s4374_s19 = sld [smem:[#allocation13_spill]]  ;;  %s4375_s18 = sld [smem:[#allocation6_spill]] }
0x162c   : > { %p3403_p7 = scmp.ge.s32.totalorder %s4374_s19, 2  ;;  %s2748_s17 = sand.u32 1, %s4375_s18  }
0x162d   : > { %s2749_s23 = scalar_lea.sflag [#allocation4], %s2748_s17 }
0x162e   : > { %p3400_p8 = pnand %p3403_p7, %p3802_p9 }
0x1630   : > { %3604 = dma.done.wait (!%p3400_p8), %s2749_s23, 64  }
0x1631   : > { %3606 = vsyncadd (!%p3400_p8), %s2749_s23, 4294967232  ;;  %s32_s23 = sadd.s32 1, %s4374_s19   ;;  %s4377_s0 = sld [smem:[#allocation7_spill]] }
0x1632   : > { %p29_p10 = scmp.ge.s32.totalorder %s32_s23, 6   ;;  %s4378_s30 = sld [smem:[#allocation8_spill]] }
0x1633   : > { %s4379_s20 = sld [smem:[#allocation18_spill]]  ;;  %s4380_s21 = sld [smem:[#allocation11_spill]] }
0x1634   : > { %s4381_s1 = sld [smem:[#allocation12_spill]]  ;;  %s4382_s22 = sld [smem:[#allocation14_spill]] }
0x1635   : > { %s4383_s2 = sld [smem:[#allocation16_spill]]  ;;  %31 = sbr.rel (!%p29_p10) target bundleno = 17 (0x11), region = 206 }
0x163c   :  { %2754 = vsyncpa [#allocation4], 1 }
0x163d   :  { %2756 = vsyncpa [#allocation4 + $0x1], 1 }

</bundles_post_ra>
